<compile_context>
chip_gen: v7x
topology: tpu7x:2x2x1
jax: 0.10.0
libtpu: 0.0.40
codegen_flags: <defaults>
</compile_context>

<pallas_src>
import functools

import jax
import jax.numpy as jnp
from jax.experimental import pallas as pl
from jax.experimental.pallas import tpu as pltpu

STD_EPS = 1e-5   # StdConv weight-standardization eps
GN_EPS = 1e-5    # nn.GroupNorm default eps


# ----------------------------------------------------------------------------- kernels

def _stdconv_gn_relu_kernel(p_ref, w_ref, gb_ref, o_ref):
    """Early layer (large spatial), channel-major lane-dense layout; one image.

    p_ref : (1, Kp, P)  bf16 im2col patches (K on sublanes, spatial P on lanes)
    w_ref : (Cout, Kp)  bf16 standardized weights (zero-padded K columns)
    gb_ref: (Cout, 2)   f32  packed [gamma | beta]
    o_ref : (1, Cout, P) bf16

    The conv bias is intentionally NOT applied: with num_groups == num_channels the
    per-channel constant is exactly cancelled by GroupNorm's mean subtraction.
    """
    y = jnp.dot(w_ref[...], p_ref[0], preferred_element_type=jnp.float32)   # (Cout, P)
    psz = y.shape[-1]
    # One-pass GroupNorm stats over spatial (the lane axis).
    s1 = jnp.sum(y, axis=-1, keepdims=True)
    s2 = jnp.sum(y * y, axis=-1, keepdims=True)
    mu = s1 * (1.0 / psz)
    var = s2 * (1.0 / psz) - mu * mu                                         # biased, like nn.GroupNorm
    scale = gb_ref[:, 0:1] * jax.lax.rsqrt(var + GN_EPS)
    shift = gb_ref[:, 1:2] - mu * scale
    o_ref[0] = jnp.maximum(y * scale + shift, 0.0).astype(o_ref.dtype)


def _gn_relu_spatial_major(y, gb):
    """GroupNorm(C groups == C channels) + ReLU for a spatial-major (P, C) f32 tile."""
    psz = y.shape[0]
    s1 = jnp.sum(y, axis=0, keepdims=True)
    s2 = jnp.sum(y * y, axis=0, keepdims=True)
    mu = s1 * (1.0 / psz)
    var = s2 * (1.0 / psz) - mu * mu
    scale = gb[0:1, :] * jax.lax.rsqrt(var + GN_EPS)
    shift = gb[1:2, :] - mu * scale
    return jnp.maximum(y * scale + shift, 0.0).astype(jnp.bfloat16)


def _conv_taps(g_ref, w_ref, act_bf16):
    """Sum over taps of (gather @ act) @ w_tap.  g is an exact 0/1 selection, so the
    gather matmul reproduces zero-padded im2col; all accumulation is f32."""
    acc = None
    for t in range(g_ref.shape[0]):
        pt = jnp.dot(g_ref[t], act_bf16, preferred_element_type=jnp.float32)   # (Po, Ci)
        term = jnp.dot(pt.astype(jnp.bfloat16), w_ref[t],
                       preferred_element_type=jnp.float32)                     # (Po, Co)
        acc = term if acc is None else acc + term
    return acc


def _deep_fused_kernel(p3_ref, w3_ref, gb3_ref, g4_ref, w4_ref, gb4_ref,
                       g5_ref, w5_ref, b5_ref, o_ref):
    """Fused [StdConv3+GN+ReLU] -> [StdConv4+GN+ReLU] -> [patchify conv + bias]; one image.

    p3_ref : (1, P3, K3p)  bf16  spatial-major layer-3 im2col patches
    w3_ref : (K3p, C3)     bf16  standardized layer-3 weights
    gb3_ref: (2, C3)       f32   [gamma; beta]
    g4_ref : (T4, P4, P3)  bf16  per-tap 0/1 gather matrices (layer-4 im2col)
    w4_ref : (T4, C3, C4)  bf16  per-tap standardized layer-4 weights
    gb4_ref: (2, C4)       f32
    g5_ref : (T5, P5, P4)  bf16  per-tap gather matrices (final patchify im2col)
    w5_ref : (T5, C4, F)   bf16  per-tap final conv weights (no standardization)
    b5_ref : (1, F)        f32
    o_ref  : (1, P5, F)    f32   spatial-major output (F on lanes -> dense stores)
    """
    # ---- layer 3: single matmul on pre-gathered patches, then GN + ReLU ----
    y3 = jnp.dot(p3_ref[0], w3_ref[...], preferred_element_type=jnp.float32)   # (P3, C3)
    y3 = _gn_relu_spatial_major(y3, gb3_ref[...])                              # bf16

    # ---- layer 4: in-kernel im2col (gather matmuls) + conv, then GN + ReLU ----
    y4 = _gn_relu_spatial_major(_conv_taps(g4_ref, w4_ref, y3), gb4_ref[...])  # (P4, C4) bf16

    # ---- final patchify conv + bias (plain Conv2d, no GN) ----
    acc5 = _conv_taps(g5_ref, w5_ref, y4)                                      # (P5, F)
    o_ref[0] = (acc5 + b5_ref[...]).astype(o_ref.dtype)


# ----------------------------------------------------------------------------- glue

def _round_up(x, m):
    return (x + m - 1) // m * m


def _weight_standardize(w):
    """torch weight_standardize: per-out-channel, unbiased (K-1) variance (torch.var_mean)."""
    cout = w.shape[0]
    wf = w.reshape(cout, -1).astype(jnp.float32)
    mean = jnp.mean(wf, axis=1, keepdims=True)
    denom = max(wf.shape[1] - 1, 1)                       # guard K == 1
    var = jnp.sum((wf - mean) ** 2, axis=1, keepdims=True) / denom
    return ((wf - mean) / jnp.sqrt(var + STD_EPS)).reshape(w.shape)


def _flatten_w_cout_major(w, k_pad):
    """(Cout,Cin,kh,kw) -> (Cout, k_pad) bf16, K order (tap, cin)."""
    cout, cin, kh, kw = w.shape
    wf = jnp.transpose(w, (0, 2, 3, 1)).reshape(cout, kh * kw * cin)
    k = kh * kw * cin
    if k_pad > k:
        wf = jnp.pad(wf, ((0, 0), (0, k_pad - k)))
    return wf.astype(jnp.bfloat16)


def _flatten_w_k_major(w, k_pad):
    """(Cout,Cin,kh,kw) -> (k_pad, Cout) bf16, K order (tap, cin)."""
    cout, cin, kh, kw = w.shape
    wf = jnp.transpose(w, (2, 3, 1, 0)).reshape(kh * kw * cin, cout)
    k = kh * kw * cin
    if k_pad > k:
        wf = jnp.pad(wf, ((0, k_pad - k), (0, 0)))
    return wf.astype(jnp.bfloat16)


def _stack_w_per_tap(w):
    """(Cout,Cin,kh,kw) -> (kh*kw, Cin, Cout) bf16 per-tap transposed weights."""
    cout, cin, kh, kw = w.shape
    return jnp.transpose(w, (2, 3, 1, 0)).reshape(kh * kw, cin, cout).astype(jnp.bfloat16)


def _im2col_cmajor(x_nchw, kh, kw, stride, pad):
    """NCHW -> (N, kh*kw*C, Ho*Wo) patches, K order (tap, cin), spatial row-major."""
    n, c, h, w = x_nchw.shape
    if pad > 0:
        x_nchw = jnp.pad(x_nchw, ((0, 0), (0, 0), (pad, pad), (pad, pad)))
    hp, wp = h + 2 * pad, w + 2 * pad
    ho = (hp - kh) // stride + 1
    wo = (wp - kw) // stride + 1
    slabs = [x_nchw[:, :, i:i + stride * ho:stride, j:j + stride * wo:stride]
             for i in range(kh) for j in range(kw)]
    p = jnp.stack(slabs, axis=1)                                   # (N, taps, C, Ho, Wo)
    return p.reshape(n, kh * kw * c, ho * wo), ho, wo


def _im2col_smajor(x_nchw, kh, kw, stride, pad):
    """NCHW -> (N, Ho*Wo, kh*kw*C) spatial-major patches, K order (tap, cin)."""
    n, c, h, w = x_nchw.shape
    if pad > 0:
        x_nchw = jnp.pad(x_nchw, ((0, 0), (0, 0), (pad, pad), (pad, pad)))
    hp, wp = h + 2 * pad, w + 2 * pad
    ho = (hp - kh) // stride + 1
    wo = (wp - kw) // stride + 1
    slabs = [x_nchw[:, :, i:i + stride * ho:stride, j:j + stride * wo:stride]
             for i in range(kh) for j in range(kw)]
    p = jnp.stack(slabs, axis=1)                                   # (N, taps, C, Ho, Wo)
    p = jnp.transpose(p, (0, 3, 4, 1, 2))                          # (N, Ho, Wo, taps, C)
    return p.reshape(n, ho * wo, kh * kw * c), ho, wo


def _gather_mats(h, w, kh, kw, stride, pad):
    """Per-tap 0/1 selection matrices (kh*kw, Ho*Wo, H*W) bf16.

    G[t, r*Wo+c, y*W+x] = 1  iff (y, x) == (stride*r + i - pad, stride*c + j - pad)
    for tap t = i*kw + j (0 for out-of-range -> zero padding)."""
    ho = (h + 2 * pad - kh) // stride + 1
    wo = (w + 2 * pad - kw) // stride + 1
    mats = []
    for i in range(kh):
        for j in range(kw):
            rows = stride * jnp.arange(ho) + i - pad
            cols = stride * jnp.arange(wo) + j - pad
            rh = (jnp.arange(h)[None, :] == rows[:, None]).astype(jnp.float32)   # (Ho, H)
            cw = (jnp.arange(w)[None, :] == cols[:, None]).astype(jnp.float32)   # (Wo, W)
            g = jnp.einsum('rh,cw->rchw', rh, cw).reshape(ho * wo, h * w)
            mats.append(g)
    return jnp.stack(mats, 0).astype(jnp.bfloat16), ho, wo


def _stdconv_gn_relu(x_nchw, w, gamma, beta, stride, pad):
    """Early-layer StdConv + GroupNorm + ReLU (one pallas_call, grid over batch)."""
    cout, cin, kh, kw = w.shape
    patches, ho, wo = _im2col_cmajor(x_nchw, kh, kw, stride, pad)     # (N, K, P)
    n, k, p = patches.shape
    kp = _round_up(k, 16)                                             # bf16 native (16,128) packing
    if kp > k:
        patches = jnp.pad(patches, ((0, 0), (0, kp - k), (0, 0)))
    patches = patches.astype(jnp.bfloat16)

    w_flat = _flatten_w_cout_major(_weight_standardize(w), kp)        # (Cout, Kp) bf16
    gb = jnp.stack([gamma, beta], axis=1).astype(jnp.float32)         # (Cout, 2)

    out = pl.pallas_call(
        _stdconv_gn_relu_kernel,
        out_shape=jax.ShapeDtypeStruct((n, cout, p), jnp.bfloat16),
        grid=(n,),
        in_specs=[
            pl.BlockSpec((1, kp, p), lambda i: (i, 0, 0)),
            pl.BlockSpec((cout, kp), lambda i: (0, 0)),
            pl.BlockSpec((cout, 2), lambda i: (0, 0)),
        ],
        out_specs=pl.BlockSpec((1, cout, p), lambda i: (i, 0, 0)),
        compiler_params=pltpu.CompilerParams(dimension_semantics=("parallel",)),
    )(patches, w_flat, gb)
    return out.reshape(n, cout, ho, wo)        # NCHW (bf16) for the next layer


def _deep_fused(x_nchw, l3, l4, final, stride3, pad3, stride4, pad4):
    """Fused layers 3, 4 + final patchify conv (one pallas_call, grid over batch)."""
    n = x_nchw.shape[0]
    w3, w4, wf = l3["w"], l4["w"], final["w"]
    c3, c4, feat = w3.shape[0], w4.shape[0], wf.shape[0]
    k5 = wf.shape[2]                            # patchify kernel == stride, 'valid'

    # Layer-3 patches (spatial-major) built in the wrapper; layers 4/5 gather in-kernel.
    p3, ho3, wo3 = _im2col_smajor(x_nchw, w3.shape[2], w3.shape[3], stride3, pad3)
    _, p3n, k3 = p3.shape
    k3p = _round_up(k3, 16)
    if k3p > k3:
        p3 = jnp.pad(p3, ((0, 0), (0, 0), (0, k3p - k3)))
    p3 = p3.astype(jnp.bfloat16)

    w3_flat = _flatten_w_k_major(_weight_standardize(w3), k3p)        # (K3p, C3)
    gb3 = jnp.stack([l3["gamma"], l3["beta"]], axis=0).astype(jnp.float32)   # (2, C3)

    g4, ho4, wo4 = _gather_mats(ho3, wo3, w4.shape[2], w4.shape[3], stride4, pad4)
    w4_taps = _stack_w_per_tap(_weight_standardize(w4))               # (T4, C3, C4)
    gb4 = jnp.stack([l4["gamma"], l4["beta"]], axis=0).astype(jnp.float32)   # (2, C4)

    g5, ho5, wo5 = _gather_mats(ho4, wo4, k5, k5, k5, 0)              # valid patchify
    w5_taps = _stack_w_per_tap(wf)                                    # (T5, C4, F)  (plain conv)
    b5 = final["b"].reshape(1, feat).astype(jnp.float32)

    t4, p4n, _ = g4.shape
    t5, p5n, _ = g5.shape

    out = pl.pallas_call(
        _deep_fused_kernel,
        out_shape=jax.ShapeDtypeStruct((n, p5n, feat), jnp.float32),
        grid=(n,),
        in_specs=[
            pl.BlockSpec((1, p3n, k3p), lambda i: (i, 0, 0)),
            pl.BlockSpec((k3p, c3), lambda i: (0, 0)),
            pl.BlockSpec((2, c3), lambda i: (0, 0)),
            pl.BlockSpec((t4, p4n, p3n), lambda i: (0, 0, 0)),
            pl.BlockSpec((t4, c3, c4), lambda i: (0, 0, 0)),
            pl.BlockSpec((2, c4), lambda i: (0, 0)),
            pl.BlockSpec((t5, p5n, p4n), lambda i: (0, 0, 0)),
            pl.BlockSpec((t5, c4, feat), lambda i: (0, 0, 0)),
            pl.BlockSpec((1, feat), lambda i: (0, 0)),
        ],
        out_specs=pl.BlockSpec((1, p5n, feat), lambda i: (i, 0, 0)),
        compiler_params=pltpu.CompilerParams(dimension_semantics=("parallel",)),
    )(p3, w3_flat, gb3, g4, w4_taps, gb4, g5, w5_taps, b5)
    return out.reshape(n, ho5, wo5, feat)      # NHWC, matching x.permute(0, 2, 3, 1)


# ----------------------------------------------------------------------------- model

def init_small_stem_params(key, *, num_inp_channels, kernel_sizes, strides,
                           features, padding, patch_size, num_features):
    params = {"layers": []}
    cin = num_inp_channels
    for ks, feat in zip(kernel_sizes, features):
        key, k1, k2, k3, k4 = jax.random.split(key, 5)
        params["layers"].append({
            "w": 0.1 * jax.random.normal(k1, (feat, cin, ks, ks), jnp.float32),
            # Conv bias is kept for module parity but is exactly cancelled by the
            # per-channel GroupNorm mean subtraction, so the kernels never apply it.
            "b": 0.1 * jax.random.normal(k2, (feat,), jnp.float32),
            "gamma": 1.0 + 0.05 * jax.random.normal(k3, (feat,), jnp.float32),
            "beta": 0.05 * jax.random.normal(k4, (feat,), jnp.float32),
        })
        cin = feat
    pk = patch_size // 16
    key, k1, k2 = jax.random.split(key, 3)
    params["final"] = {
        "w": 0.1 * jax.random.normal(k1, (num_features, features[-1], pk, pk),
                                     jnp.float32),
        "b": 0.1 * jax.random.normal(k2, (num_features,), jnp.float32),
    }
    return params


def small_stem_forward(params, observations, *, strides, padding, patch_size):
    """observations: NCHW (channels <= 4) or NHWC (channels > 4), like the module.

    Returns NHWC features, matching `SmallStem.forward(...)` (which ends with
    `x.permute(0, 2, 3, 1)`).
    """
    if observations.shape[1] > 4:
        x = jnp.transpose(observations, (0, 3, 1, 2))   # NHWC -> NCHW (module behavior)
    else:
        x = observations                                # already NCHW
    x = x.astype(jnp.float32) / 127.5 - 1.0             # img_norm_type == 'default'

    layers = params["layers"]
    assert len(layers) == 4, "this stem fuses layers 3,4 + final conv"

    # Large-spatial layers: lane-dense channel-major kernels (P = Ho*Wo on lanes).
    for idx in range(2):
        l = layers[idx]
        x = _stdconv_gn_relu(x, l["w"], l["gamma"], l["beta"],
                             strides[idx], padding[idx])

    # Deep layers 3, 4 + final patchify conv fused into one per-image kernel.
    return _deep_fused(x, layers[2], layers[3], params["final"],
                       strides[2], padding[2], strides[3], padding[3])


# ----------------------------------------------------------------------------- main

if __name__ == "__main__":
    kernel_sizes = (3, 3, 3, 3)
    strides = (2, 2, 2, 2)
    features = (8, 16, 32, 64)
    padding = (1, 1, 1, 1)
    patch_size = 32          # final conv: kernel 2x2, stride 2, 'valid'
    num_features = 128
    num_inp_channels = 3

    key = jax.random.PRNGKey(0)
    key, pkey, xkey = jax.random.split(key, 3)
    params = init_small_stem_params(
        pkey, num_inp_channels=num_inp_channels, kernel_sizes=kernel_sizes,
        strides=strides, features=features, padding=padding,
        patch_size=patch_size, num_features=num_features)

    # Deterministic "image" input, NCHW, pixel-range values.
    observations = 255.0 * jax.random.uniform(
        xkey, (2, num_inp_channels, 64, 64), jnp.float32)

    fwd = functools.partial(small_stem_forward, strides=strides, padding=padding,
                            patch_size=patch_size)
    out = jax.jit(fwd)(params, observations)
    out = jax.block_until_ready(out)

    # Input 64x64 -> four stride-2 convs -> 4x4 -> 2x2 patchify conv -> 2x2.
    assert out.shape == (2, 2, 2, num_features), out.shape
    assert bool(jnp.all(jnp.isfinite(out)))
    print("KERNEL_OK")
</pallas_src>

<mosaic_0001>
module attributes {stable_mosaic.version = 11 : i64} {
  func.func @_stdconv_gn_relu_kernel(%arg0: i32, %arg1: memref<1x32x1024xbf16, #tpu.memory_space<vmem>>, %arg2: memref<8x32xbf16, #tpu.memory_space<vmem>>, %arg3: memref<8x2xf32, #tpu.memory_space<vmem>>, %arg4: memref<1x8x1024xbf16, #tpu.memory_space<vmem>>) attributes {dimension_semantics = [#tpu.dimension_semantics<parallel>], iteration_bounds = array<i64: 2>, scalar_prefetch = 0 : i64, scratch_operands = 0 : i64, tpu.core_type = #tpu.core_type<tc>, window_params = [{transform_indices = @transform_0, window_bounds = array<i64: 1, 32, 1024>}, {pipeline_mode = #tpu.pipeline_mode<synchronous>, transform_indices = @transform_1, window_bounds = array<i64: 8, 32>}, {pipeline_mode = #tpu.pipeline_mode<synchronous>, transform_indices = @transform_2, window_bounds = array<i64: 8, 2>}, {transform_indices = @transform_3, window_bounds = array<i64: 1, 8, 1024>}]} {
    %c0 = arith.constant 0 : index
    %c0_0 = arith.constant 0 : index
    %0 = vector.load %arg2[%c0, %c0_0] : memref<8x32xbf16, #tpu.memory_space<vmem>>, vector<8x32xbf16>
    %c0_1 = arith.constant 0 : index
    %c0_2 = arith.constant 0 : index
    %c0_3 = arith.constant 0 : index
    %1 = vector.load %arg1[%c0_1, %c0_2, %c0_3] : memref<1x32x1024xbf16, #tpu.memory_space<vmem>>, vector<1x32x1024xbf16>
    %2 = vector.shape_cast %1 : vector<1x32x1024xbf16> to vector<32x1024xbf16>
    %cst = arith.constant dense<0.000000e+00> : vector<8x1024xf32>
    %3 = tpu.matmul %0, %2, %cst {dimension_numbers = #tpu.dot_dimension_numbers<[1], [0], [0], [1], [0, 0, 1, 1], [], []>} : vector<8x32xbf16>, vector<32x1024xbf16>, vector<8x1024xf32> -> vector<8x1024xf32>
    %cst_4 = arith.constant dense<0.000000e+00> : vector<8xf32>
    %4 = vector.multi_reduction <add>, %3, %cst_4 [1] : vector<8x1024xf32> to vector<8xf32>
    %5 = vector.shape_cast %4 : vector<8xf32> to vector<8x1xf32>
    %6 = arith.mulf %3, %3 : vector<8x1024xf32>
    %cst_5 = arith.constant dense<0.000000e+00> : vector<8xf32>
    %7 = vector.multi_reduction <add>, %6, %cst_5 [1] : vector<8x1024xf32> to vector<8xf32>
    %8 = vector.shape_cast %7 : vector<8xf32> to vector<8x1xf32>
    %cst_6 = arith.constant 9.765625E-4 : f32
    %9 = vector.broadcast %cst_6 : f32 to vector<8x1xf32>
    %10 = arith.mulf %5, %9 : vector<8x1xf32>
    %cst_7 = arith.constant 9.765625E-4 : f32
    %11 = vector.broadcast %cst_7 : f32 to vector<8x1xf32>
    %12 = arith.mulf %8, %11 : vector<8x1xf32>
    %13 = arith.mulf %10, %10 : vector<8x1xf32>
    %14 = arith.subf %12, %13 : vector<8x1xf32>
    %c0_8 = arith.constant 0 : index
    %c0_9 = arith.constant 0 : index
    %15 = vector.load %arg3[%c0_8, %c0_9] : memref<8x2xf32, #tpu.memory_space<vmem>>, vector<8x1xf32>
    %cst_10 = arith.constant 9.99999974E-6 : f32
    %16 = vector.broadcast %cst_10 : f32 to vector<8x1xf32>
    %17 = arith.addf %14, %16 : vector<8x1xf32>
    %18 = math.rsqrt %17 : vector<8x1xf32>
    %19 = arith.mulf %15, %18 : vector<8x1xf32>
    %c0_11 = arith.constant 0 : index
    %c1 = arith.constant 1 : index
    %20 = vector.load %arg3[%c0_11, %c1] : memref<8x2xf32, #tpu.memory_space<vmem>>, vector<8x1xf32>
    %21 = arith.mulf %10, %19 : vector<8x1xf32>
    %22 = arith.subf %20, %21 : vector<8x1xf32>
    %23 = vector.broadcast %19 : vector<8x1xf32> to vector<8x1024xf32>
    %24 = arith.mulf %3, %23 : vector<8x1024xf32>
    %25 = vector.broadcast %22 : vector<8x1xf32> to vector<8x1024xf32>
    %26 = arith.addf %24, %25 : vector<8x1024xf32>
    %cst_12 = arith.constant 0.000000e+00 : f32
    %27 = vector.broadcast %cst_12 : f32 to vector<8x1024xf32>
    %28 = arith.maximumf %26, %27 : vector<8x1024xf32>
    %29 = arith.truncf %28 : vector<8x1024xf32> to vector<8x1024xbf16>
    %c0_13 = arith.constant 0 : index
    %c0_14 = arith.constant 0 : index
    %c0_15 = arith.constant 0 : index
    %30 = vector.load %arg4[%c0_13, %c0_14, %c0_15] : memref<1x8x1024xbf16, #tpu.memory_space<vmem>>, vector<1x8x1024xbf16>
    %31 = vector.shape_cast %30 : vector<1x8x1024xbf16> to vector<8x1024xbf16>
    %32 = vector.shape_cast %29 : vector<8x1024xbf16> to vector<1x8x1024xbf16>
    tpu.vector_store %arg4[%c0_13, %c0_14, %c0_15], %32 {strides = array<i32>} : memref<1x8x1024xbf16, #tpu.memory_space<vmem>>, vector<1x8x1024xbf16>,
    return
  }
  func.func @transform_0(%arg0: i32) -> (i32, i32, i32) {
    %c0_i32 = arith.constant 0 : i32
    %c0_i32_0 = arith.constant 0 : i32
    %c0_i32_1 = arith.constant 0 : i32
    return %arg0, %c0_i32, %c0_i32_0 : i32, i32, i32
  }
  func.func @transform_1(%arg0: i32) -> (i32, i32) {
    %c0_i32 = arith.constant 0 : i32
    %c0_i32_0 = arith.constant 0 : i32
    %c0_i32_1 = arith.constant 0 : i32
    return %c0_i32, %c0_i32_0 : i32, i32
  }
  func.func @transform_2(%arg0: i32) -> (i32, i32) {
    %c0_i32 = arith.constant 0 : i32
    %c0_i32_0 = arith.constant 0 : i32
    %c0_i32_1 = arith.constant 0 : i32
    return %c0_i32, %c0_i32_0 : i32, i32
  }
  func.func @transform_3(%arg0: i32) -> (i32, i32, i32) {
    %c0_i32 = arith.constant 0 : i32
    %c0_i32_0 = arith.constant 0 : i32
    %c0_i32_1 = arith.constant 0 : i32
    return %arg0, %c0_i32, %c0_i32_0 : i32, i32, i32
  }
}

module attributes {stable_mosaic.version = 11 : i64} {
  func.func @_stdconv_gn_relu_kernel(%arg0: i32, %arg1: memref<1x80x256xbf16, #tpu.memory_space<vmem>>, %arg2: memref<16x80xbf16, #tpu.memory_space<vmem>>, %arg3: memref<16x2xf32, #tpu.memory_space<vmem>>, %arg4: memref<1x16x256xbf16, #tpu.memory_space<vmem>>) attributes {dimension_semantics = [#tpu.dimension_semantics<parallel>], iteration_bounds = array<i64: 2>, scalar_prefetch = 0 : i64, scratch_operands = 0 : i64, tpu.core_type = #tpu.core_type<tc>, window_params = [{transform_indices = @transform_0, window_bounds = array<i64: 1, 80, 256>}, {pipeline_mode = #tpu.pipeline_mode<synchronous>, transform_indices = @transform_1, window_bounds = array<i64: 16, 80>}, {pipeline_mode = #tpu.pipeline_mode<synchronous>, transform_indices = @transform_2, window_bounds = array<i64: 16, 2>}, {transform_indices = @transform_3, window_bounds = array<i64: 1, 16, 256>}]} {
    %c0 = arith.constant 0 : index
    %c0_0 = arith.constant 0 : index
    %0 = vector.load %arg2[%c0, %c0_0] : memref<16x80xbf16, #tpu.memory_space<vmem>>, vector<16x80xbf16>
    %c0_1 = arith.constant 0 : index
    %c0_2 = arith.constant 0 : index
    %c0_3 = arith.constant 0 : index
    %1 = vector.load %arg1[%c0_1, %c0_2, %c0_3] : memref<1x80x256xbf16, #tpu.memory_space<vmem>>, vector<1x80x256xbf16>
    %2 = vector.shape_cast %1 : vector<1x80x256xbf16> to vector<80x256xbf16>
    %cst = arith.constant dense<0.000000e+00> : vector<16x256xf32>
    %3 = tpu.matmul %0, %2, %cst {dimension_numbers = #tpu.dot_dimension_numbers<[1], [0], [0], [1], [0, 0, 1, 1], [], []>} : vector<16x80xbf16>, vector<80x256xbf16>, vector<16x256xf32> -> vector<16x256xf32>
    %cst_4 = arith.constant dense<0.000000e+00> : vector<16xf32>
    %4 = vector.multi_reduction <add>, %3, %cst_4 [1] : vector<16x256xf32> to vector<16xf32>
    %5 = vector.shape_cast %4 : vector<16xf32> to vector<16x1xf32>
    %6 = arith.mulf %3, %3 : vector<16x256xf32>
    %cst_5 = arith.constant dense<0.000000e+00> : vector<16xf32>
    %7 = vector.multi_reduction <add>, %6, %cst_5 [1] : vector<16x256xf32> to vector<16xf32>
    %8 = vector.shape_cast %7 : vector<16xf32> to vector<16x1xf32>
    %cst_6 = arith.constant 3.906250e-03 : f32
    %9 = vector.broadcast %cst_6 : f32 to vector<16x1xf32>
    %10 = arith.mulf %5, %9 : vector<16x1xf32>
    %cst_7 = arith.constant 3.906250e-03 : f32
    %11 = vector.broadcast %cst_7 : f32 to vector<16x1xf32>
    %12 = arith.mulf %8, %11 : vector<16x1xf32>
    %13 = arith.mulf %10, %10 : vector<16x1xf32>
    %14 = arith.subf %12, %13 : vector<16x1xf32>
    %c0_8 = arith.constant 0 : index
    %c0_9 = arith.constant 0 : index
    %15 = vector.load %arg3[%c0_8, %c0_9] : memref<16x2xf32, #tpu.memory_space<vmem>>, vector<16x1xf32>
    %cst_10 = arith.constant 9.99999974E-6 : f32
    %16 = vector.broadcast %cst_10 : f32 to vector<16x1xf32>
    %17 = arith.addf %14, %16 : vector<16x1xf32>
    %18 = math.rsqrt %17 : vector<16x1xf32>
    %19 = arith.mulf %15, %18 : vector<16x1xf32>
    %c0_11 = arith.constant 0 : index
    %c1 = arith.constant 1 : index
    %20 = vector.load %arg3[%c0_11, %c1] : memref<16x2xf32, #tpu.memory_space<vmem>>, vector<16x1xf32>
    %21 = arith.mulf %10, %19 : vector<16x1xf32>
    %22 = arith.subf %20, %21 : vector<16x1xf32>
    %23 = vector.broadcast %19 : vector<16x1xf32> to vector<16x256xf32>
    %24 = arith.mulf %3, %23 : vector<16x256xf32>
    %25 = vector.broadcast %22 : vector<16x1xf32> to vector<16x256xf32>
    %26 = arith.addf %24, %25 : vector<16x256xf32>
    %cst_12 = arith.constant 0.000000e+00 : f32
    %27 = vector.broadcast %cst_12 : f32 to vector<16x256xf32>
    %28 = arith.maximumf %26, %27 : vector<16x256xf32>
    %29 = arith.truncf %28 : vector<16x256xf32> to vector<16x256xbf16>
    %c0_13 = arith.constant 0 : index
    %c0_14 = arith.constant 0 : index
    %c0_15 = arith.constant 0 : index
    %30 = vector.load %arg4[%c0_13, %c0_14, %c0_15] : memref<1x16x256xbf16, #tpu.memory_space<vmem>>, vector<1x16x256xbf16>
    %31 = vector.shape_cast %30 : vector<1x16x256xbf16> to vector<16x256xbf16>
    %32 = vector.shape_cast %29 : vector<16x256xbf16> to vector<1x16x256xbf16>
    tpu.vector_store %arg4[%c0_13, %c0_14, %c0_15], %32 {strides = array<i32>} : memref<1x16x256xbf16, #tpu.memory_space<vmem>>, vector<1x16x256xbf16>,
    return
  }
  func.func @transform_0(%arg0: i32) -> (i32, i32, i32) {
    %c0_i32 = arith.constant 0 : i32
    %c0_i32_0 = arith.constant 0 : i32
    %c0_i32_1 = arith.constant 0 : i32
    return %arg0, %c0_i32, %c0_i32_0 : i32, i32, i32
  }
  func.func @transform_1(%arg0: i32) -> (i32, i32) {
    %c0_i32 = arith.constant 0 : i32
    %c0_i32_0 = arith.constant 0 : i32
    %c0_i32_1 = arith.constant 0 : i32
    return %c0_i32, %c0_i32_0 : i32, i32
  }
  func.func @transform_2(%arg0: i32) -> (i32, i32) {
    %c0_i32 = arith.constant 0 : i32
    %c0_i32_0 = arith.constant 0 : i32
    %c0_i32_1 = arith.constant 0 : i32
    return %c0_i32, %c0_i32_0 : i32, i32
  }
  func.func @transform_3(%arg0: i32) -> (i32, i32, i32) {
    %c0_i32 = arith.constant 0 : i32
    %c0_i32_0 = arith.constant 0 : i32
    %c0_i32_1 = arith.constant 0 : i32
    return %arg0, %c0_i32, %c0_i32_0 : i32, i32, i32
  }
}

module attributes {stable_mosaic.version = 11 : i64} {
  func.func @_deep_fused_kernel(%arg0: i32, %arg1: memref<1x64x144xbf16, #tpu.memory_space<vmem>>, %arg2: memref<144x32xbf16, #tpu.memory_space<vmem>>, %arg3: memref<2x32xf32, #tpu.memory_space<vmem>>, %arg4: memref<9x16x64xbf16, #tpu.memory_space<vmem>>, %arg5: memref<9x32x64xbf16, #tpu.memory_space<vmem>>, %arg6: memref<2x64xf32, #tpu.memory_space<vmem>>, %arg7: memref<4x4x16xbf16, #tpu.memory_space<vmem>>, %arg8: memref<4x64x128xbf16, #tpu.memory_space<vmem>>, %arg9: memref<1x128xf32, #tpu.memory_space<vmem>>, %arg10: memref<1x4x128xf32, #tpu.memory_space<vmem>>) attributes {dimension_semantics = [#tpu.dimension_semantics<parallel>], iteration_bounds = array<i64: 2>, scalar_prefetch = 0 : i64, scratch_operands = 0 : i64, tpu.core_type = #tpu.core_type<tc>, window_params = [{transform_indices = @transform_0, window_bounds = array<i64: 1, 64, 144>}, {pipeline_mode = #tpu.pipeline_mode<synchronous>, transform_indices = @transform_1, window_bounds = array<i64: 144, 32>}, {pipeline_mode = #tpu.pipeline_mode<synchronous>, transform_indices = @transform_2, window_bounds = array<i64: 2, 32>}, {pipeline_mode = #tpu.pipeline_mode<synchronous>, transform_indices = @transform_3, window_bounds = array<i64: 9, 16, 64>}, {pipeline_mode = #tpu.pipeline_mode<synchronous>, transform_indices = @transform_4, window_bounds = array<i64: 9, 32, 64>}, {pipeline_mode = #tpu.pipeline_mode<synchronous>, transform_indices = @transform_5, window_bounds = array<i64: 2, 64>}, {pipeline_mode = #tpu.pipeline_mode<synchronous>, transform_indices = @transform_6, window_bounds = array<i64: 4, 4, 16>}, {pipeline_mode = #tpu.pipeline_mode<synchronous>, transform_indices = @transform_7, window_bounds = array<i64: 4, 64, 128>}, {pipeline_mode = #tpu.pipeline_mode<synchronous>, transform_indices = @transform_8, window_bounds = array<i64: 1, 128>}, {transform_indices = @transform_9, window_bounds = array<i64: 1, 4, 128>}]} {
    %c0 = arith.constant 0 : index
    %c0_0 = arith.constant 0 : index
    %c0_1 = arith.constant 0 : index
    %0 = vector.load %arg1[%c0, %c0_0, %c0_1] : memref<1x64x144xbf16, #tpu.memory_space<vmem>>, vector<1x64x144xbf16>
    %1 = vector.shape_cast %0 : vector<1x64x144xbf16> to vector<64x144xbf16>
    %c0_2 = arith.constant 0 : index
    %c0_3 = arith.constant 0 : index
    %2 = vector.load %arg2[%c0_2, %c0_3] : memref<144x32xbf16, #tpu.memory_space<vmem>>, vector<144x32xbf16>
    %cst = arith.constant dense<0.000000e+00> : vector<64x32xf32>
    %3 = tpu.matmul %1, %2, %cst {dimension_numbers = #tpu.dot_dimension_numbers<[1], [0], [0], [1], [0, 0, 1, 1], [], []>} : vector<64x144xbf16>, vector<144x32xbf16>, vector<64x32xf32> -> vector<64x32xf32>
    %c0_4 = arith.constant 0 : index
    %c0_5 = arith.constant 0 : index
    %4 = vector.load %arg3[%c0_4, %c0_5] : memref<2x32xf32, #tpu.memory_space<vmem>>, vector<2x32xf32>
    %cst_6 = arith.constant dense<0.000000e+00> : vector<32xf32>
    %5 = vector.multi_reduction <add>, %3, %cst_6 [0] : vector<64x32xf32> to vector<32xf32>
    %6 = vector.shape_cast %5 : vector<32xf32> to vector<1x32xf32>
    %7 = arith.mulf %3, %3 : vector<64x32xf32>
    %cst_7 = arith.constant dense<0.000000e+00> : vector<32xf32>
    %8 = vector.multi_reduction <add>, %7, %cst_7 [0] : vector<64x32xf32> to vector<32xf32>
    %9 = vector.shape_cast %8 : vector<32xf32> to vector<1x32xf32>
    %cst_8 = arith.constant 1.562500e-02 : f32
    %10 = vector.broadcast %cst_8 : f32 to vector<1x32xf32>
    %11 = arith.mulf %6, %10 : vector<1x32xf32>
    %cst_9 = arith.constant 1.562500e-02 : f32
    %12 = vector.broadcast %cst_9 : f32 to vector<1x32xf32>
    %13 = arith.mulf %9, %12 : vector<1x32xf32>
    %14 = arith.mulf %11, %11 : vector<1x32xf32>
    %15 = arith.subf %13, %14 : vector<1x32xf32>
    %16 = vector.extract_strided_slice %4 {offsets = [0, 0], sizes = [1, 32], strides = [1, 1]} : vector<2x32xf32> to vector<1x32xf32>
    %cst_10 = arith.constant 9.99999974E-6 : f32
    %17 = vector.broadcast %cst_10 : f32 to vector<1x32xf32>
    %18 = arith.addf %15, %17 : vector<1x32xf32>
    %19 = math.rsqrt %18 : vector<1x32xf32>
    %20 = arith.mulf %16, %19 : vector<1x32xf32>
    %21 = vector.extract_strided_slice %4 {offsets = [1, 0], sizes = [1, 32], strides = [1, 1]} : vector<2x32xf32> to vector<1x32xf32>
    %22 = arith.mulf %11, %20 : vector<1x32xf32>
    %23 = arith.subf %21, %22 : vector<1x32xf32>
    %24 = vector.broadcast %20 : vector<1x32xf32> to vector<64x32xf32>
    %25 = arith.mulf %3, %24 : vector<64x32xf32>
    %26 = vector.broadcast %23 : vector<1x32xf32> to vector<64x32xf32>
    %27 = arith.addf %25, %26 : vector<64x32xf32>
    %cst_11 = arith.constant 0.000000e+00 : f32
    %28 = vector.broadcast %cst_11 : f32 to vector<64x32xf32>
    %29 = arith.maximumf %27, %28 : vector<64x32xf32>
    %30 = arith.truncf %29 : vector<64x32xf32> to vector<64x32xbf16>
    %c0_12 = arith.constant 0 : index
    %c0_13 = arith.constant 0 : index
    %c0_14 = arith.constant 0 : index
    %31 = vector.load %arg4[%c0_12, %c0_13, %c0_14] : memref<9x16x64xbf16, #tpu.memory_space<vmem>>, vector<1x16x64xbf16>
    %32 = vector.shape_cast %31 : vector<1x16x64xbf16> to vector<16x64xbf16>
    %cst_15 = arith.constant dense<0.000000e+00> : vector<16x32xf32>
    %33 = tpu.matmul %32, %30, %cst_15 {dimension_numbers = #tpu.dot_dimension_numbers<[1], [0], [0], [1], [0, 0, 1, 1], [], []>} : vector<16x64xbf16>, vector<64x32xbf16>, vector<16x32xf32> -> vector<16x32xf32>
    %34 = arith.truncf %33 : vector<16x32xf32> to vector<16x32xbf16>
    %c0_16 = arith.constant 0 : index
    %c0_17 = arith.constant 0 : index
    %c0_18 = arith.constant 0 : index
    %35 = vector.load %arg5[%c0_16, %c0_17, %c0_18] : memref<9x32x64xbf16, #tpu.memory_space<vmem>>, vector<1x32x64xbf16>
    %36 = vector.shape_cast %35 : vector<1x32x64xbf16> to vector<32x64xbf16>
    %cst_19 = arith.constant dense<0.000000e+00> : vector<16x64xf32>
    %37 = tpu.matmul %34, %36, %cst_19 {dimension_numbers = #tpu.dot_dimension_numbers<[1], [0], [0], [1], [0, 0, 1, 1], [], []>} : vector<16x32xbf16>, vector<32x64xbf16>, vector<16x64xf32> -> vector<16x64xf32>
    %c1 = arith.constant 1 : index
    %c0_20 = arith.constant 0 : index
    %c0_21 = arith.constant 0 : index
    %38 = vector.load %arg4[%c1, %c0_20, %c0_21] : memref<9x16x64xbf16, #tpu.memory_space<vmem>>, vector<1x16x64xbf16>
    %39 = vector.shape_cast %38 : vector<1x16x64xbf16> to vector<16x64xbf16>
    %cst_22 = arith.constant dense<0.000000e+00> : vector<16x32xf32>
    %40 = tpu.matmul %39, %30, %cst_22 {dimension_numbers = #tpu.dot_dimension_numbers<[1], [0], [0], [1], [0, 0, 1, 1], [], []>} : vector<16x64xbf16>, vector<64x32xbf16>, vector<16x32xf32> -> vector<16x32xf32>
    %41 = arith.truncf %40 : vector<16x32xf32> to vector<16x32xbf16>
    %c1_23 = arith.constant 1 : index
    %c0_24 = arith.constant 0 : index
    %c0_25 = arith.constant 0 : index
    %42 = vector.load %arg5[%c1_23, %c0_24, %c0_25] : memref<9x32x64xbf16, #tpu.memory_space<vmem>>, vector<1x32x64xbf16>
    %43 = vector.shape_cast %42 : vector<1x32x64xbf16> to vector<32x64xbf16>
    %cst_26 = arith.constant dense<0.000000e+00> : vector<16x64xf32>
    %44 = tpu.matmul %41, %43, %cst_26 {dimension_numbers = #tpu.dot_dimension_numbers<[1], [0], [0], [1], [0, 0, 1, 1], [], []>} : vector<16x32xbf16>, vector<32x64xbf16>, vector<16x64xf32> -> vector<16x64xf32>
    %45 = arith.addf %37, %44 : vector<16x64xf32>
    %c2 = arith.constant 2 : index
    %c0_27 = arith.constant 0 : index
    %c0_28 = arith.constant 0 : index
    %46 = vector.load %arg4[%c2, %c0_27, %c0_28] : memref<9x16x64xbf16, #tpu.memory_space<vmem>>, vector<1x16x64xbf16>
    %47 = vector.shape_cast %46 : vector<1x16x64xbf16> to vector<16x64xbf16>
    %cst_29 = arith.constant dense<0.000000e+00> : vector<16x32xf32>
    %48 = tpu.matmul %47, %30, %cst_29 {dimension_numbers = #tpu.dot_dimension_numbers<[1], [0], [0], [1], [0, 0, 1, 1], [], []>} : vector<16x64xbf16>, vector<64x32xbf16>, vector<16x32xf32> -> vector<16x32xf32>
    %49 = arith.truncf %48 : vector<16x32xf32> to vector<16x32xbf16>
    %c2_30 = arith.constant 2 : index
    %c0_31 = arith.constant 0 : index
    %c0_32 = arith.constant 0 : index
    %50 = vector.load %arg5[%c2_30, %c0_31, %c0_32] : memref<9x32x64xbf16, #tpu.memory_space<vmem>>, vector<1x32x64xbf16>
    %51 = vector.shape_cast %50 : vector<1x32x64xbf16> to vector<32x64xbf16>
    %cst_33 = arith.constant dense<0.000000e+00> : vector<16x64xf32>
    %52 = tpu.matmul %49, %51, %cst_33 {dimension_numbers = #tpu.dot_dimension_numbers<[1], [0], [0], [1], [0, 0, 1, 1], [], []>} : vector<16x32xbf16>, vector<32x64xbf16>, vector<16x64xf32> -> vector<16x64xf32>
    %53 = arith.addf %45, %52 : vector<16x64xf32>
    %c3 = arith.constant 3 : index
    %c0_34 = arith.constant 0 : index
    %c0_35 = arith.constant 0 : index
    %54 = vector.load %arg4[%c3, %c0_34, %c0_35] : memref<9x16x64xbf16, #tpu.memory_space<vmem>>, vector<1x16x64xbf16>
    %55 = vector.shape_cast %54 : vector<1x16x64xbf16> to vector<16x64xbf16>
    %cst_36 = arith.constant dense<0.000000e+00> : vector<16x32xf32>
    %56 = tpu.matmul %55, %30, %cst_36 {dimension_numbers = #tpu.dot_dimension_numbers<[1], [0], [0], [1], [0, 0, 1, 1], [], []>} : vector<16x64xbf16>, vector<64x32xbf16>, vector<16x32xf32> -> vector<16x32xf32>
    %57 = arith.truncf %56 : vector<16x32xf32> to vector<16x32xbf16>
    %c3_37 = arith.constant 3 : index
    %c0_38 = arith.constant 0 : index
    %c0_39 = arith.constant 0 : index
    %58 = vector.load %arg5[%c3_37, %c0_38, %c0_39] : memref<9x32x64xbf16, #tpu.memory_space<vmem>>, vector<1x32x64xbf16>
    %59 = vector.shape_cast %58 : vector<1x32x64xbf16> to vector<32x64xbf16>
    %cst_40 = arith.constant dense<0.000000e+00> : vector<16x64xf32>
    %60 = tpu.matmul %57, %59, %cst_40 {dimension_numbers = #tpu.dot_dimension_numbers<[1], [0], [0], [1], [0, 0, 1, 1], [], []>} : vector<16x32xbf16>, vector<32x64xbf16>, vector<16x64xf32> -> vector<16x64xf32>
    %61 = arith.addf %53, %60 : vector<16x64xf32>
    %c4 = arith.constant 4 : index
    %c0_41 = arith.constant 0 : index
    %c0_42 = arith.constant 0 : index
    %62 = vector.load %arg4[%c4, %c0_41, %c0_42] : memref<9x16x64xbf16, #tpu.memory_space<vmem>>, vector<1x16x64xbf16>
    %63 = vector.shape_cast %62 : vector<1x16x64xbf16> to vector<16x64xbf16>
    %cst_43 = arith.constant dense<0.000000e+00> : vector<16x32xf32>
    %64 = tpu.matmul %63, %30, %cst_43 {dimension_numbers = #tpu.dot_dimension_numbers<[1], [0], [0], [1], [0, 0, 1, 1], [], []>} : vector<16x64xbf16>, vector<64x32xbf16>, vector<16x32xf32> -> vector<16x32xf32>
    %65 = arith.truncf %64 : vector<16x32xf32> to vector<16x32xbf16>
    %c4_44 = arith.constant 4 : index
    %c0_45 = arith.constant 0 : index
    %c0_46 = arith.constant 0 : index
    %66 = vector.load %arg5[%c4_44, %c0_45, %c0_46] : memref<9x32x64xbf16, #tpu.memory_space<vmem>>, vector<1x32x64xbf16>
    %67 = vector.shape_cast %66 : vector<1x32x64xbf16> to vector<32x64xbf16>
    %cst_47 = arith.constant dense<0.000000e+00> : vector<16x64xf32>
    %68 = tpu.matmul %65, %67, %cst_47 {dimension_numbers = #tpu.dot_dimension_numbers<[1], [0], [0], [1], [0, 0, 1, 1], [], []>} : vector<16x32xbf16>, vector<32x64xbf16>, vector<16x64xf32> -> vector<16x64xf32>
    %69 = arith.addf %61, %68 : vector<16x64xf32>
    %c5 = arith.constant 5 : index
    %c0_48 = arith.constant 0 : index
    %c0_49 = arith.constant 0 : index
    %70 = vector.load %arg4[%c5, %c0_48, %c0_49] : memref<9x16x64xbf16, #tpu.memory_space<vmem>>, vector<1x16x64xbf16>
    %71 = vector.shape_cast %70 : vector<1x16x64xbf16> to vector<16x64xbf16>
    %cst_50 = arith.constant dense<0.000000e+00> : vector<16x32xf32>
    %72 = tpu.matmul %71, %30, %cst_50 {dimension_numbers = #tpu.dot_dimension_numbers<[1], [0], [0], [1], [0, 0, 1, 1], [], []>} : vector<16x64xbf16>, vector<64x32xbf16>, vector<16x32xf32> -> vector<16x32xf32>
    %73 = arith.truncf %72 : vector<16x32xf32> to vector<16x32xbf16>
    %c5_51 = arith.constant 5 : index
    %c0_52 = arith.constant 0 : index
    %c0_53 = arith.constant 0 : index
    %74 = vector.load %arg5[%c5_51, %c0_52, %c0_53] : memref<9x32x64xbf16, #tpu.memory_space<vmem>>, vector<1x32x64xbf16>
    %75 = vector.shape_cast %74 : vector<1x32x64xbf16> to vector<32x64xbf16>
    %cst_54 = arith.constant dense<0.000000e+00> : vector<16x64xf32>
    %76 = tpu.matmul %73, %75, %cst_54 {dimension_numbers = #tpu.dot_dimension_numbers<[1], [0], [0], [1], [0, 0, 1, 1], [], []>} : vector<16x32xbf16>, vector<32x64xbf16>, vector<16x64xf32> -> vector<16x64xf32>
    %77 = arith.addf %69, %76 : vector<16x64xf32>
    %c6 = arith.constant 6 : index
    %c0_55 = arith.constant 0 : index
    %c0_56 = arith.constant 0 : index
    %78 = vector.load %arg4[%c6, %c0_55, %c0_56] : memref<9x16x64xbf16, #tpu.memory_space<vmem>>, vector<1x16x64xbf16>
    %79 = vector.shape_cast %78 : vector<1x16x64xbf16> to vector<16x64xbf16>
    %cst_57 = arith.constant dense<0.000000e+00> : vector<16x32xf32>
    %80 = tpu.matmul %79, %30, %cst_57 {dimension_numbers = #tpu.dot_dimension_numbers<[1], [0], [0], [1], [0, 0, 1, 1], [], []>} : vector<16x64xbf16>, vector<64x32xbf16>, vector<16x32xf32> -> vector<16x32xf32>
    %81 = arith.truncf %80 : vector<16x32xf32> to vector<16x32xbf16>
    %c6_58 = arith.constant 6 : index
    %c0_59 = arith.constant 0 : index
    %c0_60 = arith.constant 0 : index
    %82 = vector.load %arg5[%c6_58, %c0_59, %c0_60] : memref<9x32x64xbf16, #tpu.memory_space<vmem>>, vector<1x32x64xbf16>
    %83 = vector.shape_cast %82 : vector<1x32x64xbf16> to vector<32x64xbf16>
    %cst_61 = arith.constant dense<0.000000e+00> : vector<16x64xf32>
    %84 = tpu.matmul %81, %83, %cst_61 {dimension_numbers = #tpu.dot_dimension_numbers<[1], [0], [0], [1], [0, 0, 1, 1], [], []>} : vector<16x32xbf16>, vector<32x64xbf16>, vector<16x64xf32> -> vector<16x64xf32>
    %85 = arith.addf %77, %84 : vector<16x64xf32>
    %c7 = arith.constant 7 : index
    %c0_62 = arith.constant 0 : index
    %c0_63 = arith.constant 0 : index
    %86 = vector.load %arg4[%c7, %c0_62, %c0_63] : memref<9x16x64xbf16, #tpu.memory_space<vmem>>, vector<1x16x64xbf16>
    %87 = vector.shape_cast %86 : vector<1x16x64xbf16> to vector<16x64xbf16>
    %cst_64 = arith.constant dense<0.000000e+00> : vector<16x32xf32>
    %88 = tpu.matmul %87, %30, %cst_64 {dimension_numbers = #tpu.dot_dimension_numbers<[1], [0], [0], [1], [0, 0, 1, 1], [], []>} : vector<16x64xbf16>, vector<64x32xbf16>, vector<16x32xf32> -> vector<16x32xf32>
    %89 = arith.truncf %88 : vector<16x32xf32> to vector<16x32xbf16>
    %c7_65 = arith.constant 7 : index
    %c0_66 = arith.constant 0 : index
    %c0_67 = arith.constant 0 : index
    %90 = vector.load %arg5[%c7_65, %c0_66, %c0_67] : memref<9x32x64xbf16, #tpu.memory_space<vmem>>, vector<1x32x64xbf16>
    %91 = vector.shape_cast %90 : vector<1x32x64xbf16> to vector<32x64xbf16>
    %cst_68 = arith.constant dense<0.000000e+00> : vector<16x64xf32>
    %92 = tpu.matmul %89, %91, %cst_68 {dimension_numbers = #tpu.dot_dimension_numbers<[1], [0], [0], [1], [0, 0, 1, 1], [], []>} : vector<16x32xbf16>, vector<32x64xbf16>, vector<16x64xf32> -> vector<16x64xf32>
    %93 = arith.addf %85, %92 : vector<16x64xf32>
    %c8 = arith.constant 8 : index
    %c0_69 = arith.constant 0 : index
    %c0_70 = arith.constant 0 : index
    %94 = vector.load %arg4[%c8, %c0_69, %c0_70] : memref<9x16x64xbf16, #tpu.memory_space<vmem>>, vector<1x16x64xbf16>
    %95 = vector.shape_cast %94 : vector<1x16x64xbf16> to vector<16x64xbf16>
    %cst_71 = arith.constant dense<0.000000e+00> : vector<16x32xf32>
    %96 = tpu.matmul %95, %30, %cst_71 {dimension_numbers = #tpu.dot_dimension_numbers<[1], [0], [0], [1], [0, 0, 1, 1], [], []>} : vector<16x64xbf16>, vector<64x32xbf16>, vector<16x32xf32> -> vector<16x32xf32>
    %97 = arith.truncf %96 : vector<16x32xf32> to vector<16x32xbf16>
    %c8_72 = arith.constant 8 : index
    %c0_73 = arith.constant 0 : index
    %c0_74 = arith.constant 0 : index
    %98 = vector.load %arg5[%c8_72, %c0_73, %c0_74] : memref<9x32x64xbf16, #tpu.memory_space<vmem>>, vector<1x32x64xbf16>
    %99 = vector.shape_cast %98 : vector<1x32x64xbf16> to vector<32x64xbf16>
    %cst_75 = arith.constant dense<0.000000e+00> : vector<16x64xf32>
    %100 = tpu.matmul %97, %99, %cst_75 {dimension_numbers = #tpu.dot_dimension_numbers<[1], [0], [0], [1], [0, 0, 1, 1], [], []>} : vector<16x32xbf16>, vector<32x64xbf16>, vector<16x64xf32> -> vector<16x64xf32>
    %101 = arith.addf %93, %100 : vector<16x64xf32>
    %c0_76 = arith.constant 0 : index
    %c0_77 = arith.constant 0 : index
    %102 = vector.load %arg6[%c0_76, %c0_77] : memref<2x64xf32, #tpu.memory_space<vmem>>, vector<2x64xf32>
    %cst_78 = arith.constant dense<0.000000e+00> : vector<64xf32>
    %103 = vector.multi_reduction <add>, %101, %cst_78 [0] : vector<16x64xf32> to vector<64xf32>
    %104 = vector.shape_cast %103 : vector<64xf32> to vector<1x64xf32>
    %105 = arith.mulf %101, %101 : vector<16x64xf32>
    %cst_79 = arith.constant dense<0.000000e+00> : vector<64xf32>
    %106 = vector.multi_reduction <add>, %105, %cst_79 [0] : vector<16x64xf32> to vector<64xf32>
    %107 = vector.shape_cast %106 : vector<64xf32> to vector<1x64xf32>
    %cst_80 = arith.constant 6.250000e-02 : f32
    %108 = vector.broadcast %cst_80 : f32 to vector<1x64xf32>
    %109 = arith.mulf %104, %108 : vector<1x64xf32>
    %cst_81 = arith.constant 6.250000e-02 : f32
    %110 = vector.broadcast %cst_81 : f32 to vector<1x64xf32>
    %111 = arith.mulf %107, %110 : vector<1x64xf32>
    %112 = arith.mulf %109, %109 : vector<1x64xf32>
    %113 = arith.subf %111, %112 : vector<1x64xf32>
    %114 = vector.extract_strided_slice %102 {offsets = [0, 0], sizes = [1, 64], strides = [1, 1]} : vector<2x64xf32> to vector<1x64xf32>
    %cst_82 = arith.constant 9.99999974E-6 : f32
    %115 = vector.broadcast %cst_82 : f32 to vector<1x64xf32>
    %116 = arith.addf %113, %115 : vector<1x64xf32>
    %117 = math.rsqrt %116 : vector<1x64xf32>
    %118 = arith.mulf %114, %117 : vector<1x64xf32>
    %119 = vector.extract_strided_slice %102 {offsets = [1, 0], sizes = [1, 64], strides = [1, 1]} : vector<2x64xf32> to vector<1x64xf32>
    %120 = arith.mulf %109, %118 : vector<1x64xf32>
    %121 = arith.subf %119, %120 : vector<1x64xf32>
    %122 = vector.broadcast %118 : vector<1x64xf32> to vector<16x64xf32>
    %123 = arith.mulf %101, %122 : vector<16x64xf32>
    %124 = vector.broadcast %121 : vector<1x64xf32> to vector<16x64xf32>
    %125 = arith.addf %123, %124 : vector<16x64xf32>
    %cst_83 = arith.constant 0.000000e+00 : f32
    %126 = vector.broadcast %cst_83 : f32 to vector<16x64xf32>
    %127 = arith.maximumf %125, %126 : vector<16x64xf32>
    %128 = arith.truncf %127 : vector<16x64xf32> to vector<16x64xbf16>
    %c0_84 = arith.constant 0 : index
    %c0_85 = arith.constant 0 : index
    %c0_86 = arith.constant 0 : index
    %129 = vector.load %arg7[%c0_84, %c0_85, %c0_86] : memref<4x4x16xbf16, #tpu.memory_space<vmem>>, vector<1x4x16xbf16>
    %130 = vector.shape_cast %129 : vector<1x4x16xbf16> to vector<4x16xbf16>
    %cst_87 = arith.constant dense<0.000000e+00> : vector<4x64xf32>
    %131 = tpu.matmul %130, %128, %cst_87 {dimension_numbers = #tpu.dot_dimension_numbers<[1], [0], [0], [1], [0, 0, 1, 1], [], []>} : vector<4x16xbf16>, vector<16x64xbf16>, vector<4x64xf32> -> vector<4x64xf32>
    %132 = arith.truncf %131 : vector<4x64xf32> to vector<4x64xbf16>
    %c0_88 = arith.constant 0 : index
    %c0_89 = arith.constant 0 : index
    %c0_90 = arith.constant 0 : index
    %133 = vector.load %arg8[%c0_88, %c0_89, %c0_90] : memref<4x64x128xbf16, #tpu.memory_space<vmem>>, vector<1x64x128xbf16>
    %134 = vector.shape_cast %133 : vector<1x64x128xbf16> to vector<64x128xbf16>
    %cst_91 = arith.constant dense<0.000000e+00> : vector<4x128xf32>
    %135 = tpu.matmul %132, %134, %cst_91 {dimension_numbers = #tpu.dot_dimension_numbers<[1], [0], [0], [1], [0, 0, 1, 1], [], []>} : vector<4x64xbf16>, vector<64x128xbf16>, vector<4x128xf32> -> vector<4x128xf32>
    %c1_92 = arith.constant 1 : index
    %c0_93 = arith.constant 0 : index
    %c0_94 = arith.constant 0 : index
    %136 = vector.load %arg7[%c1_92, %c0_93, %c0_94] : memref<4x4x16xbf16, #tpu.memory_space<vmem>>, vector<1x4x16xbf16>
    %137 = vector.shape_cast %136 : vector<1x4x16xbf16> to vector<4x16xbf16>
    %cst_95 = arith.constant dense<0.000000e+00> : vector<4x64xf32>
    %138 = tpu.matmul %137, %128, %cst_95 {dimension_numbers = #tpu.dot_dimension_numbers<[1], [0], [0], [1], [0, 0, 1, 1], [], []>} : vector<4x16xbf16>, vector<16x64xbf16>, vector<4x64xf32> -> vector<4x64xf32>
    %139 = arith.truncf %138 : vector<4x64xf32> to vector<4x64xbf16>
    %c1_96 = arith.constant 1 : index
    %c0_97 = arith.constant 0 : index
    %c0_98 = arith.constant 0 : index
    %140 = vector.load %arg8[%c1_96, %c0_97, %c0_98] : memref<4x64x128xbf16, #tpu.memory_space<vmem>>, vector<1x64x128xbf16>
    %141 = vector.shape_cast %140 : vector<1x64x128xbf16> to vector<64x128xbf16>
    %cst_99 = arith.constant dense<0.000000e+00> : vector<4x128xf32>
    %142 = tpu.matmul %139, %141, %cst_99 {dimension_numbers = #tpu.dot_dimension_numbers<[1], [0], [0], [1], [0, 0, 1, 1], [], []>} : vector<4x64xbf16>, vector<64x128xbf16>, vector<4x128xf32> -> vector<4x128xf32>
    %143 = arith.addf %135, %142 : vector<4x128xf32>
    %c2_100 = arith.constant 2 : index
    %c0_101 = arith.constant 0 : index
    %c0_102 = arith.constant 0 : index
    %144 = vector.load %arg7[%c2_100, %c0_101, %c0_102] : memref<4x4x16xbf16, #tpu.memory_space<vmem>>, vector<1x4x16xbf16>
    %145 = vector.shape_cast %144 : vector<1x4x16xbf16> to vector<4x16xbf16>
    %cst_103 = arith.constant dense<0.000000e+00> : vector<4x64xf32>
    %146 = tpu.matmul %145, %128, %cst_103 {dimension_numbers = #tpu.dot_dimension_numbers<[1], [0], [0], [1], [0, 0, 1, 1], [], []>} : vector<4x16xbf16>, vector<16x64xbf16>, vector<4x64xf32> -> vector<4x64xf32>
    %147 = arith.truncf %146 : vector<4x64xf32> to vector<4x64xbf16>
    %c2_104 = arith.constant 2 : index
    %c0_105 = arith.constant 0 : index
    %c0_106 = arith.constant 0 : index
    %148 = vector.load %arg8[%c2_104, %c0_105, %c0_106] : memref<4x64x128xbf16, #tpu.memory_space<vmem>>, vector<1x64x128xbf16>
    %149 = vector.shape_cast %148 : vector<1x64x128xbf16> to vector<64x128xbf16>
    %cst_107 = arith.constant dense<0.000000e+00> : vector<4x128xf32>
    %150 = tpu.matmul %147, %149, %cst_107 {dimension_numbers = #tpu.dot_dimension_numbers<[1], [0], [0], [1], [0, 0, 1, 1], [], []>} : vector<4x64xbf16>, vector<64x128xbf16>, vector<4x128xf32> -> vector<4x128xf32>
    %151 = arith.addf %143, %150 : vector<4x128xf32>
    %c3_108 = arith.constant 3 : index
    %c0_109 = arith.constant 0 : index
    %c0_110 = arith.constant 0 : index
    %152 = vector.load %arg7[%c3_108, %c0_109, %c0_110] : memref<4x4x16xbf16, #tpu.memory_space<vmem>>, vector<1x4x16xbf16>
    %153 = vector.shape_cast %152 : vector<1x4x16xbf16> to vector<4x16xbf16>
    %cst_111 = arith.constant dense<0.000000e+00> : vector<4x64xf32>
    %154 = tpu.matmul %153, %128, %cst_111 {dimension_numbers = #tpu.dot_dimension_numbers<[1], [0], [0], [1], [0, 0, 1, 1], [], []>} : vector<4x16xbf16>, vector<16x64xbf16>, vector<4x64xf32> -> vector<4x64xf32>
    %155 = arith.truncf %154 : vector<4x64xf32> to vector<4x64xbf16>
    %c3_112 = arith.constant 3 : index
    %c0_113 = arith.constant 0 : index
    %c0_114 = arith.constant 0 : index
    %156 = vector.load %arg8[%c3_112, %c0_113, %c0_114] : memref<4x64x128xbf16, #tpu.memory_space<vmem>>, vector<1x64x128xbf16>
    %157 = vector.shape_cast %156 : vector<1x64x128xbf16> to vector<64x128xbf16>
    %cst_115 = arith.constant dense<0.000000e+00> : vector<4x128xf32>
    %158 = tpu.matmul %155, %157, %cst_115 {dimension_numbers = #tpu.dot_dimension_numbers<[1], [0], [0], [1], [0, 0, 1, 1], [], []>} : vector<4x64xbf16>, vector<64x128xbf16>, vector<4x128xf32> -> vector<4x128xf32>
    %159 = arith.addf %151, %158 : vector<4x128xf32>
    %c0_116 = arith.constant 0 : index
    %c0_117 = arith.constant 0 : index
    %160 = vector.load %arg9[%c0_116, %c0_117] : memref<1x128xf32, #tpu.memory_space<vmem>>, vector<1x128xf32>
    %161 = vector.broadcast %160 : vector<1x128xf32> to vector<4x128xf32>
    %162 = arith.addf %159, %161 : vector<4x128xf32>
    %c0_118 = arith.constant 0 : index
    %c0_119 = arith.constant 0 : index
    %c0_120 = arith.constant 0 : index
    %163 = vector.load %arg10[%c0_118, %c0_119, %c0_120] : memref<1x4x128xf32, #tpu.memory_space<vmem>>, vector<1x4x128xf32>
    %164 = vector.shape_cast %163 : vector<1x4x128xf32> to vector<4x128xf32>
    %165 = vector.shape_cast %162 : vector<4x128xf32> to vector<1x4x128xf32>
    tpu.vector_store %arg10[%c0_118, %c0_119, %c0_120], %165 {strides = array<i32>} : memref<1x4x128xf32, #tpu.memory_space<vmem>>, vector<1x4x128xf32>,
    return
  }
  func.func @transform_0(%arg0: i32) -> (i32, i32, i32) {
    %c0_i32 = arith.constant 0 : i32
    %c0_i32_0 = arith.constant 0 : i32
    %c0_i32_1 = arith.constant 0 : i32
    return %arg0, %c0_i32, %c0_i32_0 : i32, i32, i32
  }
  func.func @transform_1(%arg0: i32) -> (i32, i32) {
    %c0_i32 = arith.constant 0 : i32
    %c0_i32_0 = arith.constant 0 : i32
    %c0_i32_1 = arith.constant 0 : i32
    return %c0_i32, %c0_i32_0 : i32, i32
  }
  func.func @transform_2(%arg0: i32) -> (i32, i32) {
    %c0_i32 = arith.constant 0 : i32
    %c0_i32_0 = arith.constant 0 : i32
    %c0_i32_1 = arith.constant 0 : i32
    return %c0_i32, %c0_i32_0 : i32, i32
  }
  func.func @transform_3(%arg0: i32) -> (i32, i32, i32) {
    %c0_i32 = arith.constant 0 : i32
    %c0_i32_0 = arith.constant 0 : i32
    %c0_i32_1 = arith.constant 0 : i32
    %c0_i32_2 = arith.constant 0 : i32
    return %c0_i32, %c0_i32_0, %c0_i32_1 : i32, i32, i32
  }
  func.func @transform_4(%arg0: i32) -> (i32, i32, i32) {
    %c0_i32 = arith.constant 0 : i32
    %c0_i32_0 = arith.constant 0 : i32
    %c0_i32_1 = arith.constant 0 : i32
    %c0_i32_2 = arith.constant 0 : i32
    return %c0_i32, %c0_i32_0, %c0_i32_1 : i32, i32, i32
  }
  func.func @transform_5(%arg0: i32) -> (i32, i32) {
    %c0_i32 = arith.constant 0 : i32
    %c0_i32_0 = arith.constant 0 : i32
    %c0_i32_1 = arith.constant 0 : i32
    return %c0_i32, %c0_i32_0 : i32, i32
  }
  func.func @transform_6(%arg0: i32) -> (i32, i32, i32) {
    %c0_i32 = arith.constant 0 : i32
    %c0_i32_0 = arith.constant 0 : i32
    %c0_i32_1 = arith.constant 0 : i32
    %c0_i32_2 = arith.constant 0 : i32
    return %c0_i32, %c0_i32_0, %c0_i32_1 : i32, i32, i32
  }
  func.func @transform_7(%arg0: i32) -> (i32, i32, i32) {
    %c0_i32 = arith.constant 0 : i32
    %c0_i32_0 = arith.constant 0 : i32
    %c0_i32_1 = arith.constant 0 : i32
    %c0_i32_2 = arith.constant 0 : i32
    return %c0_i32, %c0_i32_0, %c0_i32_1 : i32, i32, i32
  }
  func.func @transform_8(%arg0: i32) -> (i32, i32) {
    %c0_i32 = arith.constant 0 : i32
    %c0_i32_0 = arith.constant 0 : i32
    %c0_i32_1 = arith.constant 0 : i32
    return %c0_i32, %c0_i32_0 : i32, i32
  }
  func.func @transform_9(%arg0: i32) -> (i32, i32, i32) {
    %c0_i32 = arith.constant 0 : i32
    %c0_i32_0 = arith.constant 0 : i32
    %c0_i32_1 = arith.constant 0 : i32
    return %arg0, %c0_i32, %c0_i32_0 : i32, i32, i32
  }
}

</mosaic_0001>

<bundles_post_ra>
// kernel: small_stem_forward.3
= control target key start
LH: loop header
LB: loop body
LE: loop exit
PB: predicated region body
PF: predicated region fallthrough
CT: control target
= control target key end

     0   :  { %s689_s12 = smov 0   ;;  %s738_s0 = inlined_call_operand.vmem [shape: bf16[2,32,1024], index: 0, kind: input, shape index: {}]   ;;  %s739_s1 = inlined_call_operand.vmem [shape: bf16[8,32], index: 1, kind: input, shape index: {}]   ;;  %s740_s2 = inlined_call_operand.vmem [shape: f32[8,2], index: 2, kind: input, shape index: {}]   ;;  %s741_s3 = inlined_call_operand.vmem [shape: bf16[2,8,1024], index: 3, kind: output, shape index: {}]  }
   0x1 LB: > { %s602_s13 = sadd.s32 4294967295, %s664_s12   ;;  %p606_p0 = scmp.ge.s32.totalorder %s664_s12, 1  ;;  %s664_s12 = sphi %s689_s12, %s13_s12  }
   0x2   : > { %p137_p1 = scmp.lt.s32.totalorder %s664_s12, 3 }
   0x4   : > { %p138_p2 = pnand %p606_p0, %p137_p1 }
   0x5   : > { %p161_p3 = scmp.lt.s32.totalorder (!%p138_p2), %s602_s13, 1  ;;  %v666_v0 = vmov (!%p138_p2), 0   ;;  %v172_v27 = vld [vmem:[%s739_s1] sm:$0xf] (!%p138_p2)  ;;  %vm269_vm0 = vcmask (!%p138_p2), 261120   ;;  %s668_s22 = smov (!%p138_p2), 1  }
   0x6   : > { %141 = sbr.rel (%p138_p2) target bundleno = 676 (0x2a4), region = 32  ;;  %305 = vmatprep.mubr.bf16.mxu0 (!%p138_p2), %v666_v0  ;;  %346 = vmatprep.mubr.bf16.mxu1 (!%p138_p2), %v666_v0 }
   0x7   : > { %654 = vset.pattern.permute.xlu1 (!%p138_p2), %v666_v0 }
   0xd   : > { %s743_s13 = smov (!%p161_p3, %s602_s13), 1 }
   0xe   : > { %s637_s14 = sshll.u32 %s743_s13, 7  ;;  %s638_s23 = sshll.u32 %s743_s13, 5 }
   0xf   : > { %s703_s17 = scalar_lea.vmem %s738_s0, %s637_s14  ;;  %s170_s26 = scalar_lea.vmem %s741_s3, %s638_s23 }
  0x10   : > { %v173_v1 = vld [vmem:[%s703_s17] sm:$0xff]  ;;  %v174_v3 = vld [vmem:[%s703_s17 + $0x8] sm:$0xff]  ;;  %v175_v14 = vld [vmem:[%s703_s17 + $0x10] sm:$0xff] }
  0x11   : > { %v177_v2 = vld [vmem:[%s703_s17 + $0x20] sm:$0xff]  ;;  %v178_v6 = vld [vmem:[%s703_s17 + $0x28] sm:$0xff]  ;;  %v179_v16 = vld [vmem:[%s703_s17 + $0x30] sm:$0xff] }
  0x12   : > { %v612_v4 = vcombine.high %v173_v1, %v177_v2  ;;  %v611_v5 = vcombine.low %v173_v1, %v177_v2  ;;  %v181_v7 = vld [vmem:[%s703_s17 + $0x40] sm:$0xff]  ;;  %v614_v9 = vcombine.high %v174_v3, %v178_v6  ;;  %v613_v10 = vcombine.low %v174_v3, %v178_v6  ;;  %v182_v12 = vld [vmem:[%s703_s17 + $0x48] sm:$0xff]  ;;  %v176_v17 = vld [vmem:[%s703_s17 + $0x18] sm:$0xff] }
  0x13   : > { %v185_v8 = vld [vmem:[%s703_s17 + $0x60] sm:$0xff]  ;;  %v186_v13 = vld [vmem:[%s703_s17 + $0x68] sm:$0xff]  ;;  %v180_v18 = vld [vmem:[%s703_s17 + $0x38] sm:$0xff]  ;;  %v616_v21 = vcombine.high %v175_v14, %v179_v16  ;;  %v615_v28 = vcombine.low %v175_v14, %v179_v16 }
  0x14   : > { %v620_v11 = vcombine.high %v181_v7, %v185_v8  ;;  %273 = vmatprep.subr.bf16.mxu0 %v612_v4  ;;  %v622_v15 = vcombine.high %v182_v12, %v186_v13  ;;  %314 = vmatprep.subr.bf16.mxu1 %v614_v9  ;;  %v619_v19 = vcombine.low %v181_v7, %v185_v8  ;;  %v183_v23 = vld [vmem:[%s703_s17 + $0x50] sm:$0xff]  ;;  %v184_v25 = vld [vmem:[%s703_s17 + $0x58] sm:$0xff]  ;;  %v467_v16 = vld [vmem:[%s740_s2] sm:$0xff] }
  0x15   : > { %274 = vmatpush1.bf16.msra.mxu0 %v611_v5  ;;  %315 = vmatpush1.bf16.msra.mxu1 %v613_v10  ;;  %v621_v20 = vcombine.low %v182_v12, %v186_v13  ;;  %v618_v22 = vcombine.high %v176_v17, %v180_v18  ;;  %v187_v24 = vld [vmem:[%s703_s17 + $0x70] sm:$0xff]  ;;  %v188_v26 = vld [vmem:[%s703_s17 + $0x78] sm:$0xff]  ;;  %v617_v29 = vcombine.low %v176_v17, %v180_v18 }
  0x16   : > { %275 = vmatprep.subr.bf16.mxu0 %v620_v11  ;;  %316 = vmatprep.subr.bf16.mxu1 %v622_v15  ;;  %v624_v30 = vcombine.high %v183_v23, %v187_v24  ;;  %v626_v31 = vcombine.high %v184_v25, %v188_v26  ;;  %v623_v32 = vcombine.low %v183_v23, %v187_v24  ;;  %v667_v15 = vmov 1  }
  0x17   : > { %v625_v33 = vcombine.low %v184_v25, %v188_v26  ;;  %655 = vset.pattern.permute.xlu0 %v667_v15 }
  0x19   : > { %276 = vmatpush1.bf16.msra.mxu0 %v619_v19  ;;  %317 = vmatpush1.bf16.msra.mxu1 %v621_v20 }
  0x1a   : > { %355 = vmatprep.subr.bf16.mxu0 %v616_v21  ;;  %396 = vmatprep.subr.bf16.mxu1 %v618_v22 }
  0x1c   : > { %627 = vmatmul.mubr.msk.bf16.vlgmr.msra.gmra.mrb[0].mxu0 %vm269_vm0, %v172_v27  ;;  %628 = vmatmul.mubr.msk.bf16.vlgmr.msra.gmra.mrb[0].mxu1 %vm269_vm0, %v172_v27 }
  0x1d   : > { %356 = vmatpush1.bf16.msra.mxu0 %v615_v28  ;;  %397 = vmatpush1.bf16.msra.mxu1 %v617_v29 }
  0x1e   : > { %357 = vmatprep.subr.bf16.mxu0 %v624_v30  ;;  %398 = vmatprep.subr.bf16.mxu1 %v626_v31 }
  0x1f   : > { %387 = vmatprep.mubr.bf16.mxu0 %v666_v0  ;;  %428 = vmatprep.mubr.bf16.mxu1 %v666_v0 }
  0x21   : > { %358 = vmatpush1.bf16.msra.mxu0 %v623_v32  ;;  %399 = vmatpush1.bf16.msra.mxu1 %v625_v33 }
  0x24   : > { %629 = vmatmul.mubr.msk.bf16.vlgmr.msra.gmra.mrb[4].mxu0 %vm269_vm0, %v172_v27  ;;  %630 = vmatmul.mubr.msk.bf16.vlgmr.msra.gmra.mrb[4].mxu1 %vm269_vm0, %v172_v27 }
  0xef   : > { %v307_v34 = vpop.f32.mrb[0].mxu0  ;;  %v348_v37 = vpop.f32.mrb[0].mxu1 }
  0xf0   : > { %v446_v35 = vmul.f32 %v307_v34, %v307_v34  ;;  %v309_v36 = vpop.f32.mrb[1].mxu0  ;;  %v448_v41 = vmul.f32 %v348_v37, %v348_v37  ;;  %v350_v42 = vpop.f32.mrb[1].mxu1 }
  0xf1   : > { %v437_v38 = vadd.f32 %v309_v36, %v307_v34  ;;  %v447_v39 = vmul.f32 %v309_v36, %v309_v36  ;;  %v311_v40 = vpop.f32.mrb[2].mxu0  ;;  %v352_v44 = vpop.f32.mrb[2].mxu1  ;;  %v449_v47 = vmul.f32 %v350_v42, %v350_v42 }
  0xf2   : > { %v312_v43 = vpop.f32.mrb[3].mxu0  ;;  %v353_v48 = vpop.f32.mrb[3].mxu1 }
  0xf3   : > { %v454_v45 = vadd.f32 %v447_v39, %v446_v35  ;;  %v438_v46 = vadd.f32 %v437_v38, %v348_v37 }
  0xf5   : > { %v455_v49 = vadd.f32 %v454_v45, %v448_v41  ;;  %v439_v50 = vadd.f32 %v438_v46, %v350_v42 }
  0xf7   : > { %v456_v51 = vadd.f32 %v455_v49, %v449_v47  ;;  %v389_v52 = vpop.f32.mrb[4].mxu0  ;;  %v430_v56 = vpop.f32.mrb[4].mxu1 }
  0xf8   : > { %v440_v53 = vadd.f32 %v439_v50, %v389_v52  ;;  %v450_v54 = vmul.f32 %v389_v52, %v389_v52  ;;  %v391_v55 = vpop.f32.mrb[5].mxu0  ;;  %v432_v59 = vpop.f32.mrb[5].mxu1  ;;  %v452_v62 = vmul.f32 %v430_v56, %v430_v56 }
  0xf9   : > { %v451_v57 = vmul.f32 %v391_v55, %v391_v55  ;;  %v393_v58 = vpop.f32.mrb[6].mxu0  ;;  %v434_v0 = vpop.f32.mrb[6].mxu1  ;;  %v453_v5 = vmul.f32 %v432_v59, %v432_v59 }
  0xfa   : > { %v457_v60 = vadd.f32 %v456_v51, %v450_v54  ;;  %v441_v61 = vadd.f32 %v440_v53, %v391_v55  ;;  %v394_v63 = vpop.f32.mrb[7].mxu0  ;;  %v435_v1 = vpop.f32.mrb[7].mxu1 }
  0xfc   : > { %v442_v2 = vadd.f32 %v441_v61, %v430_v56  ;;  %v458_v3 = vadd.f32 %v457_v60, %v451_v57 }
  0xfe   : > { %v443_v4 = vadd.f32 %v442_v2, %v432_v59  ;;  %v459_v6 = vadd.f32 %v458_v3, %v452_v62 }
 0x100   : > { %444 = vadd.xlane.f32.xlu0 %v443_v4  ;;  %v460_v7 = vadd.f32 %v459_v6, %v453_v5 }
 0x104   : > { %461 = vadd.xlane.f32.xlu0 %v460_v7 }
 0x18d   : > { %v445_v8 = vpop.xlane.xlu0 %444 }
 0x18e   : > { %v463_v9 = vmul.f32 0.0009765625, %v445_v8 }
 0x190   : > { %v465_v11 = vmul.f32 %v463_v9, %v463_v9 }
 0x191   : > { %v462_v10 = vpop.xlane.xlu0 %461 }
 0x192   : > { %v464_v12 = vmul.f32 0.0009765625, %v462_v10 }
 0x194   : > { %v466_v13 = vsub.f32 %v464_v12, %v465_v11 }
 0x196   : > { %v468_v14 = vadd.f32 1e-05, %v466_v13 }
 0x198   : > { %656 = vrsqrt.f32 %v468_v14 }
 0x1a2   : > { %v657_v17 = vpop.eup %656 }
 0x1a3   : > { %v470_v18 = vmul.f32 %v657_v17, %v467_v16 }
 0x1a5   : > { %v471_v19 = vmul.f32 %v470_v18, %v463_v9 }
 0x1a7   : > { %473 = vrot.lane.b32.xlu1 %v471_v19, %s668_s22 }
 0x1ab   : > { %479 = vperm.xlu1 %654, %v470_v18  }
 0x219   : > { %v474_v20 = vpop.permute.xlu1 %473 }
 0x21a   : > { %v476_v21 = vsub.f32 %v467_v16, %v474_v20 }
 0x21c   : > { %492 = vperm.xlu0 %655, %v476_v21  }
 0x22a   : > { %v480_v22 = vpop.permute.xlu1 %479 }
 0x22b   : > { %v482_v23 = vmul.f32 %v480_v22, %v307_v34  ;;  %v483_v24 = vmul.f32 %v480_v22, %v309_v36  ;;  %v484_v25 = vmul.f32 %v480_v22, %v348_v37  ;;  %v485_v26 = vmul.f32 %v480_v22, %v350_v42 }
 0x22c   : > { %v486_v27 = vmul.f32 %v480_v22, %v389_v52  ;;  %v487_v28 = vmul.f32 %v480_v22, %v391_v55  ;;  %v488_v29 = vmul.f32 %v480_v22, %v430_v56  ;;  %v489_v30 = vmul.f32 %v480_v22, %v432_v59 }
 0x29b   : > { %v493_v31 = vpop.permute.xlu0 %492 }
 0x29c   : > { %v495_v32 = vadd.f32 %v493_v31, %v482_v23  ;;  %v496_v33 = vadd.f32 %v493_v31, %v483_v24  ;;  %v497_v35 = vadd.f32 %v493_v31, %v484_v25  ;;  %v498_v38 = vadd.f32 %v493_v31, %v485_v26 }
 0x29d   : > { %v499_v39 = vadd.f32 %v493_v31, %v486_v27  ;;  %v500_v40 = vadd.f32 %v493_v31, %v487_v28  ;;  %v501_v41 = vadd.f32 %v493_v31, %v488_v29  ;;  %v502_v43 = vadd.f32 %v493_v31, %v489_v30 }
 0x29e   : > { %v503_v44 = vmax.f32 %v495_v32, 0.0  ;;  %v504_v45 = vmax.f32 %v496_v33, 0.0  ;;  %v505_v34 = vmax.f32 %v497_v35, 0.0  ;;  %v506_v36 = vmax.f32 %v498_v38, 0.0 }
 0x29f   : > { %v507_v37 = vmax.f32 %v499_v39, 0.0  ;;  %v508_v42 = vmax.f32 %v500_v40, 0.0  ;;  %v509_v46 = vmax.f32 %v501_v41, 0.0  ;;  %v510_v47 = vmax.f32 %v502_v43, 0.0 }
 0x2a0   : > { %v639_v48 = vpack.c.bf16 %v504_v45, %v503_v44  ;;  %v640_v49 = vpack.c.bf16 %v506_v36, %v505_v34 }
 0x2a1   : > { %v641_v50 = vpack.c.bf16 %v508_v42, %v507_v37  ;;  %v642_v51 = vpack.c.bf16 %v510_v47, %v509_v46 }
 0x2a2   : > { %543 = vst [vmem:[%s170_s26] sm:$0xff] %v639_v48  ;;  %544 = vst [vmem:[%s170_s26 + $0x8] sm:$0xff] %v640_v49 }
 0x2a3   : > { %545 = vst [vmem:[%s170_s26 + $0x10] sm:$0xff] %v641_v50  ;;  %546 = vst [vmem:[%s170_s26 + $0x18] sm:$0xff] %v642_v51 }
 0x2a4 PF: > { %s13_s12 = sadd.s32 1, %s664_s12  }
 0x2a5   : > { %p10_p4 = scmp.ge.s32.totalorder %s13_s12, 4  }
 0x2a7   :  { %12 = sbr.rel (!%p10_p4) target bundleno = 1 (0x1), region = 62 }

// kernel: small_stem_forward.4
= control target key start
LH: loop header
LB: loop body
LE: loop exit
PB: predicated region body
PF: predicated region fallthrough
CT: control target
= control target key end

     0   :  { %s524_s12 = smov 0   ;;  %s554_s0 = inlined_call_operand.vmem [shape: bf16[2,80,256], index: 0, kind: input, shape index: {}]   ;;  %s555_s1 = inlined_call_operand.vmem [shape: bf16[16,80], index: 1, kind: input, shape index: {}]   ;;  %s556_s2 = inlined_call_operand.vmem [shape: f32[16,2], index: 2, kind: input, shape index: {}]   ;;  %s557_s3 = inlined_call_operand.vmem [shape: bf16[2,16,256], index: 3, kind: output, shape index: {}]  }
   0x1 LB: > { %s431_s13 = sadd.s32 4294967295, %s499_s12   ;;  %p435_p0 = scmp.ge.s32.totalorder %s499_s12, 1  ;;  %s499_s12 = sphi %s524_s12, %s13_s12  }
   0x2   : > { %p137_p1 = scmp.lt.s32.totalorder %s499_s12, 3 }
   0x4   : > { %p138_p2 = pnand %p435_p0, %p137_p1 }
   0x5   : > { %p161_p3 = scmp.lt.s32.totalorder (!%p138_p2), %s431_s13, 1  ;;  %v501_v0 = vmov (!%p138_p2), 0   ;;  %v488_v11 = vld [vmem:[%s555_s1] sm:$0xff] (!%p138_p2)   ;;  %vm239_vm0 = vcmask (!%p138_p2), 654336   ;;  %v502_v38 = vmov (!%p138_p2), 1   ;;  %v311_v42 = vld [vmem:[%s556_s2 + $0x8] sm:$0xff] (!%p138_p2) }
   0x6   : > { %141 = sbr.rel (%p138_p2) target bundleno = 674 (0x2a2), region = 32  ;;  %275 = vmatprep.mubr.bf16.mxu0 (!%p138_p2), %v501_v0  ;;  %470 = vset.pattern.permute.xlu1 (!%p138_p2), %v501_v0  ;;  %v310_v39 = vld [vmem:[%s556_s2] sm:$0xff] (!%p138_p2)  ;;  %s503_s24 = smov (!%p138_p2), 1  }
   0x7   : > { %471 = vset.pattern.permute.xlu0 (!%p138_p2), %v502_v38 }
   0xd   : > { %s559_s13 = smov (!%p161_p3, %s431_s13), 1 }
   0xe   : > { %s458_s14 = smul.u32 80, %s559_s13  ;;  %s455_s25 = sshll.u32 %s559_s13, 4 }
   0xf   : > { %s170_s28 = scalar_lea.vmem %s557_s3, %s455_s25 }
  0x10   : > { %s165_s17 = scalar_lea.vmem %s554_s0, %s458_s14 }
  0x11   : > { %v473_v1 = vld [vmem:[%s165_s17 + $0x4] ss:$8 sps:$4 sm:$0xff]   ;;  %v475_v2 = vld [vmem:[%s165_s17] ss:$8 sps:$4 sm:$0xff]   ;;  %v476_v3 = vld [vmem:[%s165_s17 + $0x14] ss:$8 sps:$4 sm:$0xff]  }
  0x12   : > { %243 = vmatprep.subr.bf16.mxu0 %v473_v1  ;;  %v478_v4 = vld [vmem:[%s165_s17 + $0x10] ss:$8 sps:$4 sm:$0xff]   ;;  %v479_v5 = vld [vmem:[%s165_s17 + $0x24] ss:$8 sps:$4 sm:$0xff]   ;;  %v481_v6 = vld [vmem:[%s165_s17 + $0x20] ss:$8 sps:$4 sm:$0xff]  }
  0x13   : > { %244 = vmatpush1.bf16.msra.mxu0 %v475_v2  ;;  %v482_v7 = vld [vmem:[%s165_s17 + $0x34] ss:$8 sps:$4 sm:$0xff]   ;;  %v484_v8 = vld [vmem:[%s165_s17 + $0x30] ss:$8 sps:$4 sm:$0xff]   ;;  %v485_v9 = vld [vmem:[%s165_s17 + $0x44] ss:$8 sps:$4 sm:$0xff]  }
  0x14   : > { %245 = vmatprep.subr.bf16.mxu0 %v476_v3  ;;  %v487_v10 = vld [vmem:[%s165_s17 + $0x40] ss:$8 sps:$4 sm:$0xff]  }
  0x17   : > { %246 = vmatpush1.bf16.msra.mxu0 %v478_v4 }
  0x18   : > { %247 = vmatprep.subr.bf16.mxu0 %v479_v5 }
  0x1b   : > { %248 = vmatpush1.bf16.msra.mxu0 %v481_v6 }
  0x1c   : > { %249 = vmatprep.subr.bf16.mxu0 %v482_v7 }
  0x1f   : > { %250 = vmatpush1.bf16.msra.mxu0 %v484_v8 }
  0x20   : > { %251 = vmatprep.subr.bf16.mxu0 %v485_v9 }
  0x23   : > { %252 = vmatpush1.bf16.msra.mxu0 %v487_v10 }
  0x26   : > { %450 = vmatmul.mubr.msk.bf16.vlgmr.msra.gmra.mrb[0].mxu0 %vm239_vm0, %v488_v11 }
  0xf9   : > { %v277_v12 = vpop.f32.mrb[0].mxu0 }
  0xfa   : > { %v279_v13 = vpop.f32.mrb[1].mxu0  ;;  %v292_v14 = vmul.f32 %v277_v12, %v277_v12 }
  0xfb   : > { %v281_v15 = vpop.f32.mrb[2].mxu0  ;;  %v286_v16 = vadd.f32 %v279_v13, %v277_v12  ;;  %v293_v17 = vmul.f32 %v279_v13, %v279_v13 }
  0xfc   : > { %v283_v18 = vpop.f32.mrb[3].mxu0  ;;  %v294_v19 = vmul.f32 %v281_v15, %v281_v15 }
  0xfd   : > { %v295_v20 = vmul.f32 %v283_v18, %v283_v18  ;;  %287 = vadd.xlane.f32.xlu0 %v286_v16  ;;  %v296_v21 = vadd.f32 %v293_v17, %v292_v14  ;;  %v289_v22 = vadd.f32 %v283_v18, %v281_v15 }
  0xff   : > { %297 = vadd.xlane.f32.xlu1 %v296_v21  ;;  %v299_v23 = vadd.f32 %v295_v20, %v294_v19 }
 0x101   : > { %290 = vadd.xlane.f32.xlu0 %v289_v22 }
 0x103   : > { %300 = vadd.xlane.f32.xlu1 %v299_v23 }
 0x18a   : > { %v288_v24 = vpop.xlane.xlu0 %287 }
 0x18b   : > { %v302_v25 = vmul.f32 0.00390625, %v288_v24 }
 0x18c   : > { %v298_v26 = vpop.xlane.xlu1 %297 }
 0x18d   : > { %v306_v27 = vmul.f32 %v302_v25, %v302_v25  ;;  %v304_v28 = vmul.f32 0.00390625, %v298_v26 }
 0x18e   : > { %v291_v29 = vpop.xlane.xlu0 %290 }
 0x18f   : > { %v308_v30 = vsub.f32 %v304_v28, %v306_v27  ;;  %v303_v31 = vmul.f32 0.00390625, %v291_v29 }
 0x190   : > { %v301_v32 = vpop.xlane.xlu1 %300 }
 0x191   : > { %v312_v33 = vadd.f32 1e-05, %v308_v30  ;;  %v307_v34 = vmul.f32 %v303_v31, %v303_v31  ;;  %v305_v35 = vmul.f32 0.00390625, %v301_v32 }
 0x193   : > { %489 = vrsqrt.f32 %v312_v33  ;;  %v309_v36 = vsub.f32 %v305_v35, %v307_v34 }
 0x195   : > { %v313_v37 = vadd.f32 1e-05, %v309_v36 }
 0x197   : > { %491 = vrsqrt.f32 %v313_v37 }
 0x19d   : > { %v490_v40 = vpop.eup %489 }
 0x19e   : > { %v316_v41 = vmul.f32 %v490_v40, %v310_v39 }
 0x1a0   : > { %v318_v43 = vmul.f32 %v316_v41, %v302_v25 }
 0x1a1   : > { %v492_v44 = vpop.eup %491 }
 0x1a2   : > { %322 = vrot.lane.b32.xlu0 %v318_v43, %s503_s24  ;;  %v317_v45 = vmul.f32 %v492_v44, %v311_v42 }
 0x1a4   : > { %v319_v46 = vmul.f32 %v317_v45, %v303_v31 }
 0x1a6   : > { %324 = vrot.lane.b32.xlu1 %v319_v46, %s503_s24 }
 0x1aa   : > { %332 = vperm.xlu1 %470, %v316_v41  }
 0x1ae   : > { %337 = vperm.xlu1 %470, %v317_v45  }
 0x1b2   : > { %472 = vset.pattern.permute.xlu1 %v502_v38 }
 0x214   : > { %v323_v47 = vpop.permute.xlu0 %322 }
 0x215   : > { %v328_v48 = vsub.f32 %v310_v39, %v323_v47 }
 0x217   : > { %346 = vperm.xlu0 %471, %v328_v48  }
 0x218   : > { %v325_v49 = vpop.permute.xlu1 %324 }
 0x219   : > { %v329_v50 = vsub.f32 %v311_v42, %v325_v49 }
 0x21b   : > { %351 = vperm.xlu1 %472, %v329_v50  }
 0x229   : > { %v333_v51 = vpop.permute.xlu1 %332 }
 0x22a   : > { %v340_v52 = vmul.f32 %v333_v51, %v277_v12  ;;  %v341_v53 = vmul.f32 %v333_v51, %v279_v13 }
 0x22d   : > { %v338_v54 = vpop.permute.xlu1 %337 }
 0x22e   : > { %v342_v58 = vmul.f32 %v338_v54, %v281_v15  ;;  %v343_v59 = vmul.f32 %v338_v54, %v283_v18 }
 0x296   : > { %v347_v55 = vpop.permute.xlu0 %346 }
 0x297   : > { %v354_v56 = vadd.f32 %v347_v55, %v340_v52  ;;  %v355_v57 = vadd.f32 %v347_v55, %v341_v53 }
 0x299   : > { %v358_v60 = vmax.f32 %v354_v56, 0.0  ;;  %v359_v61 = vmax.f32 %v355_v57, 0.0 }
 0x29a   : > { %v352_v62 = vpop.permute.xlu1 %351 }
 0x29b   : > { %v456_v63 = vpack.c.bf16 %v359_v61, %v358_v60  ;;  %v356_v0 = vadd.f32 %v352_v62, %v342_v58  ;;  %v357_v1 = vadd.f32 %v352_v62, %v343_v59 }
 0x29d   : > { %374 = vst [vmem:[%s170_s28] sm:$0xff] %v456_v63  ;;  %v360_v2 = vmax.f32 %v356_v0, 0.0  ;;  %v361_v3 = vmax.f32 %v357_v1, 0.0 }
 0x29f   : > { %v457_v4 = vpack.c.bf16 %v361_v3, %v360_v2 }
 0x2a1   : > { %375 = vst [vmem:[%s170_s28 + $0x8] sm:$0xff] %v457_v4 }
 0x2a2 PF: > { %s13_s12 = sadd.s32 1, %s499_s12  }
 0x2a3   : > { %p10_p4 = scmp.ge.s32.totalorder %s13_s12, 4  }
 0x2a5   :  { %12 = sbr.rel (!%p10_p4) target bundleno = 1 (0x1), region = 62 }

// kernel: small_stem_forward.5
= control target key start
LH: loop header
LB: loop body
LE: loop exit
PB: predicated region body
PF: predicated region fallthrough
CT: control target
= control target key end

     0   :  { %14 = vsyncpa [#allocation3], 0  ;;  %s3616_s0 = inlined_call_operand.vmem [shape: bf16[2,64,144], index: 0, kind: input, shape index: {}]   ;;  %s3617_s1 = inlined_call_operand.vmem [shape: bf16[144,32], index: 1, kind: input, shape index: {}]   ;;  %s3618_s2 = inlined_call_operand.vmem [shape: f32[2,32], index: 2, kind: input, shape index: {}]   ;;  %s3619_s3 = inlined_call_operand.vmem [shape: bf16[9,16,64], index: 3, kind: input, shape index: {}]   ;;  %s3620_s4 = inlined_call_operand.vmem [shape: bf16[9,32,64], index: 4, kind: input, shape index: {}]   ;;  %s3621_s5 = inlined_call_operand.vmem [shape: f32[2,64], index: 5, kind: input, shape index: {}]   ;;  %s3622_s6 = inlined_call_operand.vmem [shape: bf16[4,4,16], index: 6, kind: input, shape index: {}]   ;;  %s3623_s7 = inlined_call_operand.vmem [shape: bf16[4,64,128], index: 7, kind: input, shape index: {}]   ;;  %s3624_s8 = inlined_call_operand.vmem [shape: f32[1,128], index: 8, kind: input, shape index: {}]   ;;  %s3625_s9 = inlined_call_operand.hbm [shape: f32[2,4,128], index: 9, kind: output, shape index: {}]  }
   0x1   :  { %16 = vsyncpa [#allocation3 + $0x1], 0  ;;  %s3073_s30 = smov 0   ;;  %s3075_s10 = smov 0  }
   0x2   :  { %s3077_s11 = smov 0   ;;  %s3079_s12 = smov 0  }
   0x3 LB: > { %s3094_s13 = sadd.s32 4294967295, %s3017_s12   ;;  %s2283_s14 = sadd.s32 4294967294, %s3017_s12   ;;  %s3017_s12 = sphi %s3079_s12, %s3631_s12   ;;  %s3013_s11 = sphi %s3077_s11, %s3630_s11   ;;  %s3009_s10 = sphi %s3075_s10, %s3629_s10   ;;  %s3005_s30 = sphi %s3073_s30, %s3628_s30  }
   0x4   : > { %s3098_s15 = sadd.s32 1, %s3017_s12   ;;  %s223_s16 = sadd.s32 1, %s3013_s11 }
   0x5   : > { %s220_s17 = ssub.s32 %s3017_s12, %s3098_s15  ;;  %p233_p0 = scmp.ne.s32.totalorder %s3013_s11, %s3009_s10 }
   0x6   : > { %p221_p1 = scmp.eq.s32.totalorder %s220_s17, 0  ;;  %p234_p2 = scmp.eq.s32.totalorder %s3094_s13, 1 }
   0x7   : > { %p239_p3 = scmp.ne.s32.totalorder %s3009_s10, %s3005_s30  ;;  %p240_p4 = scmp.eq.s32.totalorder %s2283_s14, 1 }
   0x8   : > { %s3109_s18 = scalar_select %p221_p1, %s3013_s11, %s223_s16  }
   0x9   : > { %p3111_p5 = por %p234_p2, %p233_p0  ;;  %p3115_p6 = por %p240_p4, %p239_p3 }
   0xa   : > { %p2286_p7 = scmp.ge.s32.totalorder %s3017_s12, 1  ;;  %p290_p8 = scmp.lt.s32.totalorder %s3017_s12, 3 }
   0xc   : > { %p291_p9 = pnand %p2286_p7, %p290_p8 }
   0xd   : > { %v2887_v0 = vld [vmem:[%s3617_s1] sm:$0xff] (!%p291_p9)   ;;  %v3019_v1 = vmov (!%p291_p9), 0   ;;  %p326_p10 = scmp.lt.s32.totalorder (!%p291_p9), %s3094_s13, 1  ;;  %v2888_v2 = vld [vmem:[%s3617_s1 + $0x8] sm:$0xff] (!%p291_p9)   ;;  %v2889_v3 = vld [vmem:[%s3617_s1 + $0x10] sm:$0xff] (!%p291_p9)   ;;  %vm448_vm0 = vcmask (!%p291_p9), 130048  }
   0xe   : > { %294 = sbr.rel (%p291_p9) target bundleno = 2070 (0x816), region = 56  ;;  %461 = vmatprep.subr.bf16.mxu0 (!%p291_p9), %v3019_v1  ;;  %v2890_v4 = vld [vmem:[%s3617_s1 + $0x18] sm:$0xff] (!%p291_p9)   ;;  %v2891_v6 = vld [vmem:[%s3617_s1 + $0x20] sm:$0xff] (!%p291_p9)   ;;  %v2892_v7 = vld [vmem:[%s3617_s1 + $0x28] sm:$0xff] (!%p291_p9)   ;;  %v3020_v18 = vmov (!%p291_p9), 0.0   ;;  %vm3021_vm1 = vmmov (!%p291_p9), 0  }
   0xf   : > { %462 = vmatpush1.bf16.msra.mxu0 (!%p291_p9), %v2887_v0  ;;  %v2893_v8 = vld [vmem:[%s3617_s1 + $0x30] sm:$0xff] (!%p291_p9)   ;;  %v2894_v9 = vld [vmem:[%s3617_s1 + $0x38] sm:$0xff] (!%p291_p9)   ;;  %v2895_v10 = vld [vmem:[%s3617_s1 + $0x40] sm:$0xff] (!%p291_p9)   ;;  %2561 = vmatprep.subr.bf16.mxu1 (!%p291_p9), %v3020_v18  ;;  %vm527_vm2 = vcmask (!%p291_p9), 261120   ;;  %vm633_vm3 = vcmask (!%p291_p9), 523264   ;;  %s323_s22 = sand.u32 (!%p291_p9), 1, %s3009_s10  }
  0x10   : > { %463 = vmatprep.subr.bf16.mxu0 (!%p291_p9), %v3019_v1  ;;  %2569 = vmatprep.mubr.msk.bf16.mxu1 (!%p291_p9), %vm3021_vm1, %v3020_v18  ;;  %s2287_s23 = sshll.u32 (!%p291_p9), %s323_s22, 2  ;;  %s3022_s21 = smov (!%p291_p9), [#allocation2]  }
  0x11   : > { %s325_s27 = scalar_lea.vmem (!%p291_p9), [#allocation2], %s2287_s23  ;;  %s2959_s23 = sshll.u32 (!%p291_p9), %s3022_s21, 4  ;;  %s2960_s23 = int_to_ptr.vmem [resolvable:$false] %s2959_s23 }
  0x12   : > { %s2224_s28 = sshll.u32 (!%p291_p9), %s325_s27, 4  ;;  %s2961_s24 = scalar_lea.vmem (!%p291_p9), %s2960_s23, 128  ;;  %s3576_s28 = int_to_ptr.vmem [resolvable:$true] %s2224_s28 }
  0x13   : > { %464 = vmatpush1.bf16.msra.mxu0 (!%p291_p9), %v2888_v2  ;;  %p2962_p0 = scmp.lt.s32.totalorder (!%p291_p9), %s3576_s28, %s2960_s23 }
  0x14   : > { %465 = vmatprep.subr.bf16.mxu0 (!%p291_p9), %v3019_v1 }
  0x15   : > { %s327_s25 = scalar_select %p326_p10, %s3094_s13, 1 }
  0x17   : > { %s2460_s26 = sshll.u32 %s327_s25, 6  ;;  %466 = vmatpush1.bf16.msra.mxu0 %v2889_v3 }
  0x18   : > { %s3135_s16 = scalar_lea.vmem %s3616_s0, %s2460_s26  ;;  %467 = vmatprep.subr.bf16.mxu0 %v3019_v1  ;;  %s2457_s26 = sshll.u32 %s3094_s13, 6 }
  0x19   : > { %v2898_v5 = vld [vmem:[%s3135_s16 + $0x4] ss:$8 sps:$4 sm:$0xff]   ;;  %v2896_v11 = vld [vmem:[%s3135_s16] ss:$8 sps:$4 sm:$0xff]   ;;  %v2899_v12 = vld [vmem:[%s3135_s16 + $0x14] ss:$8 sps:$4 sm:$0xff]   ;;  %s3574_s17 = scalar_lea.hbm %s3625_s9, %s2457_s26 }
  0x1a   : > { %2307 = vmatprep.mubr.msk.bf16.mxu0 %vm448_vm0, %v2898_v5  ;;  %v2901_v13 = vld [vmem:[%s3135_s16 + $0x10] ss:$8 sps:$4 sm:$0xff]   ;;  %v2902_v14 = vld [vmem:[%s3135_s16 + $0x24] ss:$8 sps:$4 sm:$0xff]   ;;  %v2904_v15 = vld [vmem:[%s3135_s16 + $0x20] ss:$8 sps:$4 sm:$0xff]  }
  0x1b   : > { %468 = vmatpush1.bf16.msra.mxu0 %v2890_v4  ;;  %v2905_v16 = vld [vmem:[%s3135_s16 + $0x34] ss:$8 sps:$4 sm:$0xff]   ;;  %v2907_v17 = vld [vmem:[%s3135_s16 + $0x30] ss:$8 sps:$4 sm:$0xff]   ;;  %s2211_s16 = scalar_lea.sflag [#allocation3], %s323_s22  ;;  %s2955_s13 = scalar_lea.vmem %s3576_s28, 64 }
  0x1c   : > { %469 = vmatprep.subr.bf16.mxu0 %v3019_v1  ;;  %p2956_p11 = scmp.ne.s32.totalorder %s3576_s28, %s2955_s13  ;;  %p2963_p1 = scmp.lt.s32.totalorder %s2961_s24, %s2955_s13 }
  0x1e   : > { %p2957_p12 = pnand %p2956_p11, %p3111_p5  ;;  %p2964_p2 = por %p2963_p1, %p2962_p0 }
  0x1f   : > { %470 = vmatpush1.bf16.msra.mxu0 %v2891_v6 }
  0x20   : > { %471 = vmatprep.subr.bf16.mxu0 %v3019_v1  ;;  %p2958_p13 = pneg %p2957_p12 }
  0x22   : > { %p2965_p3 = pnand %p2964_p2, %p2958_p13 }
  0x23   : > { %472 = vmatpush1.bf16.msra.mxu0 %v2892_v7 }
  0x24   : > { %473 = vmatprep.subr.bf16.mxu0 %v3019_v1 }
  0x27   : > { %474 = vmatpush1.bf16.msra.mxu0 %v2893_v8 }
  0x28   : > { %475 = vmatprep.subr.bf16.mxu0 %v3019_v1 }
  0x2b   : > { %476 = vmatpush1.bf16.msra.mxu0 %v2894_v9 }
  0x2c   : > { %477 = vmatprep.subr.bf16.mxu0 %v3019_v1 }
  0x2f   : > { %478 = vmatpush1.bf16.msra.mxu0 %v2895_v10 }
  0x30   : > { %2621 = vmatprep.subr.bf16.mxu0 %v3020_v18 }
  0x32   : > { %494 = vmatmul.mubr.bf16.vlgmr.msra.gmra.mrb[0].mxu0 %v2896_v11 }
  0x33   : > { %2308 = vmatprep.mubr.msk.bf16.mxu0 %vm448_vm0, %v2899_v12 }
  0x3a   : > { %502 = vmatmul.mubr.bf16.gmra.mrb[4].mxu0 %v2901_v13 }
  0x3b   : > { %2309 = vmatprep.mubr.msk.bf16.mxu0 %vm448_vm0, %v2902_v14 }
  0x42   : > { %510 = vmatmul.mubr.bf16.gmra.mrb[8].mxu0 %v2904_v15 }
  0x43   : > { %2310 = vmatprep.mubr.msk.bf16.mxu0 %vm448_vm0, %v2905_v16 }
  0x4a   : > { %518 = vmatmul.mubr.bf16.gmra.mrb[12].mxu0 %v2907_v17 }
  0x4b   : > { %2629 = vmatprep.mubr.msk.bf16.mxu0 %vm3021_vm1, %v3020_v18 }
 0x105   : > { %v3173_v19 = vpop.f32.mrb[0].mxu0 }
 0x106   : > { %v549_v20 = vmul.f32 %v3173_v19, %v3173_v19  ;;  %v497_v21 = vpop.f32.mrb[1].mxu0  ;;  %v528_v23 = vsel %vm527_vm2, %v3173_v19, 0.0 }
 0x107   : > { %v3177_v22 = vpop.f32.mrb[2].mxu0 }
 0x108   : > { %v529_v24 = vsel %vm527_vm2, %v3177_v22, 0.0  ;;  %v550_v25 = vmul.f32 %v3177_v22, %v3177_v22  ;;  %v500_v26 = vpop.f32.mrb[3].mxu0  ;;  %v557_v28 = vsel %vm527_vm2, %v549_v20, 0.0 }
 0x109   : > { %v530_v27 = vadd.f32 %v529_v24, %v528_v23 }
 0x10a   : > { %v558_v29 = vsel %vm527_vm2, %v550_v25, 0.0 }
 0x10b   : > { %v559_v30 = vadd.f32 %v558_v29, %v557_v28  ;;  %v590_v29 = vlaneseq }
 0x10d   : > { %v3187_v31 = vpop.f32.mrb[4].mxu0 }
 0x10e   : > { %v531_v32 = vsel %vm527_vm2, %v3187_v31, 0.0  ;;  %v551_v33 = vmul.f32 %v3187_v31, %v3187_v31  ;;  %v505_v34 = vpop.f32.mrb[5].mxu0 }
 0x10f   : > { %v532_v35 = vadd.f32 %v531_v32, %v530_v27  ;;  %v3193_v36 = vpop.f32.mrb[6].mxu0  ;;  %v526_v32 = vld [vmem:[%s3618_s2] sm:$0x3] }
 0x110   : > { %v560_v37 = vsel %vm527_vm2, %v551_v33, 0.0  ;;  %v533_v38 = vsel %vm527_vm2, %v3193_v36, 0.0  ;;  %v552_v39 = vmul.f32 %v3193_v36, %v3193_v36  ;;  %v508_v40 = vpop.f32.mrb[7].mxu0 }
 0x111   : > { %v561_v41 = vadd.f32 %v560_v37, %v559_v30  ;;  %v534_v42 = vadd.f32 %v533_v38, %v532_v35  ;;  %v3209_v30 = vshrl.u32 %v590_v29, 7 }
 0x112   : > { %v562_v43 = vsel %vm527_vm2, %v552_v39, 0.0 }
 0x113   : > { %v563_v44 = vadd.f32 %v562_v43, %v561_v41  ;;  %v592_v33 = vsub.s32 0, %v3209_v30  ;;  %v604_v39 = vsub.s32 1, %v3209_v30  ;;  %v2405_v30 = vld [vmem:[%s3622_s6 + $0x2] sm:$0x3] }
 0x115   : > { %v511_v45 = vpop.f32.mrb[8].mxu0 }
 0x116   : > { %v535_v46 = vsel %vm527_vm2, %v511_v45, 0.0  ;;  %v553_v47 = vmul.f32 %v511_v45, %v511_v45  ;;  %v513_v48 = vpop.f32.mrb[9].mxu0 }
 0x117   : > { %v536_v49 = vadd.f32 %v535_v46, %v534_v42  ;;  %v514_v50 = vpop.f32.mrb[10].mxu0 }
 0x118   : > { %v564_v51 = vsel %vm527_vm2, %v553_v47, 0.0  ;;  %v537_v52 = vsel %vm527_vm2, %v514_v50, 0.0  ;;  %v554_v53 = vmul.f32 %v514_v50, %v514_v50  ;;  %v516_v54 = vpop.f32.mrb[11].mxu0 }
 0x119   : > { %v565_v55 = vadd.f32 %v564_v51, %v563_v44  ;;  %v538_v56 = vadd.f32 %v537_v52, %v536_v49 }
 0x11a   : > { %v566_v57 = vsel %vm527_vm2, %v554_v53, 0.0 }
 0x11b   : > { %v567_v58 = vadd.f32 %v566_v57, %v565_v55 }
 0x11d   : > { %v519_v59 = vpop.f32.mrb[12].mxu0 }
 0x11e   : > { %v539_v60 = vsel %vm527_vm2, %v519_v59, 0.0  ;;  %v555_v61 = vmul.f32 %v519_v59, %v519_v59  ;;  %v521_v62 = vpop.f32.mrb[13].mxu0 }
 0x11f   : > { %v540_v63 = vadd.f32 %v539_v60, %v538_v56  ;;  %v522_v0 = vpop.f32.mrb[14].mxu0 }
 0x120   : > { %v568_v1 = vsel %vm527_vm2, %v555_v61, 0.0  ;;  %v541_v2 = vsel %vm527_vm2, %v522_v0, 0.0  ;;  %v556_v3 = vmul.f32 %v522_v0, %v522_v0  ;;  %v524_v4 = vpop.f32.mrb[15].mxu0 }
 0x121   : > { %v569_v5 = vadd.f32 %v568_v1, %v567_v58  ;;  %v542_v6 = vadd.f32 %v541_v2, %v540_v63  ;;  %v2909_v4 = vld [vmem:[%s3619_s3 + $0x18] sm:$0xff]  }
 0x122   : > { %v570_v7 = vsel %vm527_vm2, %v556_v3, 0.0  ;;  %v2908_v3 = vld [vmem:[%s3619_s3] sm:$0xff]  }
 0x123   : > { %v543_v8 = vrot.slane %v542_v6, 4  ;;  %v571_v9 = vadd.f32 %v570_v7, %v569_v5  ;;  %v2910_v5 = vld [vmem:[%s3619_s3 + $0x8] sm:$0xff]  }
 0x124   : > { %v2912_v7 = vld [vmem:[%s3619_s3 + $0x28] sm:$0xff]  }
 0x125   : > { %v544_v10 = vadd.f32 %v543_v8, %v542_v6  ;;  %v572_v11 = vrot.slane %v571_v9, 4  ;;  %v2911_v6 = vld [vmem:[%s3619_s3 + $0x20] sm:$0xff]   ;;  %v2913_v8 = vld [vmem:[%s3619_s3 + $0x38] sm:$0xff]  }
 0x127   : > { %v545_v12 = vrot.slane %v544_v10, 2  ;;  %v573_v13 = vadd.f32 %v572_v11, %v571_v9  ;;  %v2914_v9 = vld [vmem:[%s3620_s4 + $0x10] sm:$0xff]  }
 0x129   : > { %v546_v14 = vadd.f32 %v545_v12, %v544_v10  ;;  %v574_v15 = vrot.slane %v573_v13, 2  ;;  %v2915_v10 = vld [vmem:[%s3620_s4 + $0x18] sm:$0xff]  }
 0x12b   : > { %v547_v16 = vrot.slane %v546_v14, 1  ;;  %v575_v17 = vadd.f32 %v574_v15, %v573_v13 }
 0x12d   : > { %v548_v20 = vadd.f32 %v547_v16, %v546_v14  ;;  %v576_v21 = vrot.slane %v575_v17, 1 }
 0x12f   : > { %v577_v23 = vadd.f32 %v576_v21, %v575_v17  ;;  %v578_v24 = vmul.f32 0.015625, %v548_v20  ;;  %v2916_v21 = vld [vmem:[%s3620_s4] sm:$0xff]  }
 0x131   : > { %v579_v25 = vmul.f32 0.015625, %v577_v23  ;;  %v580_v26 = vmul.f32 %v578_v24, %v578_v24 }
 0x133   : > { %v581_v27 = vsub.f32 %v579_v25, %v580_v26  ;;  %v2917_v25 = vld [vmem:[%s3620_s4 + $0x8] sm:$0xff]   ;;  %v2918_v26 = vld [vmem:[%s3619_s3 + $0x10] sm:$0xff]  }
 0x135   : > { %v582_v28 = vadd.f32 1e-05, %v581_v27  ;;  %v2919_v27 = vld [vmem:[%s3620_s4 + $0x20] sm:$0xff]  }
 0x137   : > { %2951 = vrsqrt.f32 %v582_v28  ;;  %v2920_v28 = vld [vmem:[%s3620_s4 + $0x28] sm:$0xff]  }
 0x141   : > { %v2952_v34 = vpop.eup %2951 }
 0x142   : > { %v584_v35 = vmul.f32 %v2952_v34, %v526_v32 }
 0x144   : > { %v585_v37 = vmul.f32 %v584_v35, %v578_v24  ;;  %v593_v38 = vrot.slane %v584_v35, %v592_v33 }
 0x146   : > { %v587_v40 = vrot.slane %v585_v37, 7  ;;  %v600_v41 = vmul.f32 %v593_v38, %v519_v59  ;;  %v601_v42 = vmul.f32 %v593_v38, %v522_v0  ;;  %v594_v43 = vmul.f32 %v593_v38, %v3173_v19 }
 0x147   : > { %v595_v44 = vmul.f32 %v593_v38, %v3177_v22  ;;  %v596_v46 = vmul.f32 %v593_v38, %v3187_v31  ;;  %v597_v47 = vmul.f32 %v593_v38, %v3193_v36  ;;  %v598_v48 = vmul.f32 %v593_v38, %v511_v45 }
 0x148   : > { %v589_v49 = vsub.f32 %v526_v32, %v587_v40  ;;  %v599_v51 = vmul.f32 %v593_v38, %v514_v50 }
 0x14a   : > { %v605_v52 = vrot.slane %v589_v49, %v604_v39 }
 0x14c   : > { %v612_v53 = vadd.f32 %v605_v52, %v600_v41  ;;  %v613_v54 = vadd.f32 %v605_v52, %v601_v42  ;;  %v606_v55 = vadd.f32 %v605_v52, %v594_v43  ;;  %v607_v56 = vadd.f32 %v605_v52, %v595_v44 }
 0x14d   : > { %v608_v57 = vadd.f32 %v605_v52, %v596_v46  ;;  %v609_v58 = vadd.f32 %v605_v52, %v597_v47  ;;  %v610_v59 = vadd.f32 %v605_v52, %v598_v48  ;;  %v611_v19 = vadd.f32 %v605_v52, %v599_v51  ;;  %v2928_v51 = vld [vmem:[%s3619_s3 + $0x40] sm:$0xff]  }
 0x14e   : > { %v620_v60 = vmax.f32 %v612_v53, 0.0  ;;  %v621_v22 = vmax.f32 %v613_v54, 0.0  ;;  %v614_v61 = vmax.f32 %v606_v55, 0.0  ;;  %v615_v31 = vmax.f32 %v607_v56, 0.0  ;;  %v2921_v55 = vld [vmem:[%s3620_s4 + $0x30] sm:$0xff]  }
 0x14f   : > { %v616_v62 = vmax.f32 %v608_v57, 0.0  ;;  %v617_v36 = vmax.f32 %v609_v58, 0.0  ;;  %v618_v45 = vmax.f32 %v610_v59, 0.0  ;;  %v619_v63 = vmax.f32 %v611_v19, 0.0  ;;  %v2922_v58 = vld [vmem:[%s3620_s4 + $0x38] sm:$0xff]   ;;  %v2923_v59 = vld [vmem:[%s3620_s4 + $0x40] sm:$0xff]  }
 0x150   : > { %v3224_v50 = vpack.c.bf16 %v621_v22, %v620_v60  ;;  %v3226_v0 = vpack.c.bf16 %v615_v31, %v614_v61  ;;  %v2924_v19 = vld [vmem:[%s3620_s4 + $0x48] sm:$0xff]   ;;  %v2925_v60 = vld [vmem:[%s3620_s4 + $0x50] sm:$0xff]   ;;  %v2926_v22 = vld [vmem:[%s3620_s4 + $0x58] sm:$0xff]  }
 0x151   : > { %v3228_v1 = vpack.c.bf16 %v617_v36, %v616_v62  ;;  %v3230_v2 = vpack.c.bf16 %v619_v63, %v618_v45  ;;  %v2927_v61 = vld [vmem:[%s3619_s3 + $0x30] sm:$0xff]   ;;  %v2929_v31 = vld [vmem:[%s3620_s4 + $0x60] sm:$0xff]   ;;  %v2930_v62 = vld [vmem:[%s3620_s4 + $0x68] sm:$0xff]  }
 0x152   : > { %2562 = vmatpush3.bf16.msra.mxu1 %v3226_v0  ;;  %2622 = vmatpush3.bf16.msra.mxu0 %v3226_v0 }
 0x153   : > { %2563 = vmatprep.subr.bf16.mxu1 %v3020_v18  ;;  %2623 = vmatprep.subr.bf16.mxu0 %v3020_v18 }
 0x156   : > { %2564 = vmatpush3.bf16.msra.mxu1 %v3228_v1  ;;  %2624 = vmatpush3.bf16.msra.mxu0 %v3228_v1 }
 0x157   : > { %2565 = vmatprep.subr.bf16.mxu1 %v3020_v18  ;;  %2625 = vmatprep.subr.bf16.mxu0 %v3020_v18 }
 0x15a   : > { %2566 = vmatpush3.bf16.msra.mxu1 %v3230_v2  ;;  %2626 = vmatpush3.bf16.msra.mxu0 %v3230_v2 }
 0x15b   : > { %2567 = vmatprep.subr.bf16.mxu1 %v3020_v18  ;;  %2627 = vmatprep.subr.bf16.mxu0 %v3020_v18 }
 0x15e   : > { %2568 = vmatpush3.bf16.msra.mxu1 %v3224_v50  ;;  %2628 = vmatpush3.bf16.msra.mxu0 %v3224_v50 }
 0x15f   : > { %2573 = vmatprep.subr.bf16.mxu1 %v3020_v18  ;;  %2641 = vmatprep.subr.bf16.mxu0 %v3020_v18 }
 0x161   : > { %2570 = vmatmul.mubr.msk.bf16.vlgmr.msra.gmra.mrb[0].mxu1 %vm633_vm3, %v2908_v3  ;;  %2630 = vmatmul.mubr.msk.bf16.vlgmr.msra.gmra.mrb[16].mxu0 %vm633_vm3, %v2909_v4 }
 0x162   : > { %2574 = vmatpush3.bf16.msra.mxu1 %v3226_v0  ;;  %2642 = vmatpush3.bf16.msra.mxu0 %v3226_v0 }
 0x163   : > { %2575 = vmatprep.subr.bf16.mxu1 %v3020_v18  ;;  %2643 = vmatprep.subr.bf16.mxu0 %v3020_v18 }
 0x164   : > { %2581 = vmatprep.mubr.msk.bf16.mxu1 %vm3021_vm1, %v3020_v18  ;;  %2649 = vmatprep.mubr.msk.bf16.mxu0 %vm3021_vm1, %v3020_v18 }
 0x166   : > { %2576 = vmatpush3.bf16.msra.mxu1 %v3228_v1  ;;  %2644 = vmatpush3.bf16.msra.mxu0 %v3228_v1 }
 0x167   : > { %2577 = vmatprep.subr.bf16.mxu1 %v3020_v18  ;;  %2645 = vmatprep.subr.bf16.mxu0 %v3020_v18 }
 0x16a   : > { %2578 = vmatpush3.bf16.msra.mxu1 %v3230_v2  ;;  %2646 = vmatpush3.bf16.msra.mxu0 %v3230_v2 }
 0x16b   : > { %2579 = vmatprep.subr.bf16.mxu1 %v3020_v18  ;;  %2647 = vmatprep.subr.bf16.mxu0 %v3020_v18 }
 0x16e   : > { %2580 = vmatpush3.bf16.msra.mxu1 %v3224_v50  ;;  %2648 = vmatpush3.bf16.msra.mxu0 %v3224_v50 }
 0x16f   : > { %2661 = vmatprep.subr.bf16.mxu0 %v3020_v18  ;;  %2585 = vmatprep.subr.bf16.mxu1 %v3020_v18 }
 0x171   : > { %2582 = vmatmul.mubr.msk.bf16.vlgmr.msra.gmra.mrb[4].mxu1 %vm633_vm3, %v2910_v5  ;;  %2650 = vmatmul.mubr.msk.bf16.vlgmr.msra.gmra.mrb[20].mxu0 %vm633_vm3, %v2911_v6 }
 0x172   : > { %2662 = vmatpush3.bf16.msra.mxu0 %v3226_v0  ;;  %2669 = vmatprep.mubr.msk.bf16.mxu0 %vm3021_vm1, %v3020_v18 }
 0x173   : > { %2663 = vmatprep.subr.bf16.mxu0 %v3020_v18  ;;  %2589 = vmatprep.mubr.msk.bf16.mxu1 %vm3021_vm1, %v3020_v18 }
 0x174   : > { %2586 = vmatpush3.bf16.msra.mxu1 %v2914_v9  ;;  %v2931_v9 = vld [vmem:[%s3620_s4 + $0x70] sm:$0xff]  }
 0x175   : > { %2587 = vmatprep.subr.bf16.mxu1 %v3020_v18 }
 0x176   : > { %2664 = vmatpush3.bf16.msra.mxu0 %v3228_v1 }
 0x177   : > { %2665 = vmatprep.subr.bf16.mxu0 %v3020_v18 }
 0x178   : > { %2588 = vmatpush3.bf16.msra.mxu1 %v2915_v10 }
 0x179   : > { %2593 = vmatprep.subr.bf16.mxu1 %v3020_v18 }
 0x17a   : > { %2666 = vmatpush3.bf16.msra.mxu0 %v3230_v2 }
 0x17b   : > { %2667 = vmatprep.subr.bf16.mxu0 %v3020_v18 }
 0x17e   : > { %2668 = vmatpush3.bf16.msra.mxu0 %v3224_v50 }
 0x17f   : > { %2701 = vmatprep.subr.bf16.mxu0 %v3020_v18 }
 0x181   : > { %2670 = vmatmul.mubr.msk.bf16.vlgmr.msra.gmra.mrb[24].mxu0 %vm633_vm3, %v2912_v7 }
 0x182   : > { %2702 = vmatpush3.bf16.msra.mxu0 %v3226_v0  ;;  %2709 = vmatprep.mubr.msk.bf16.mxu0 %vm3021_vm1, %v3020_v18 }
 0x183   : > { %2703 = vmatprep.subr.bf16.mxu0 %v3020_v18 }
 0x186   : > { %2704 = vmatpush3.bf16.msra.mxu0 %v3228_v1 }
 0x187   : > { %2705 = vmatprep.subr.bf16.mxu0 %v3020_v18 }
 0x18a   : > { %2706 = vmatpush3.bf16.msra.mxu0 %v3230_v2 }
 0x18b   : > { %2707 = vmatprep.subr.bf16.mxu0 %v3020_v18 }
 0x18e   : > { %2708 = vmatpush3.bf16.msra.mxu0 %v3224_v50 }
 0x18f   : > { %2721 = vmatprep.subr.bf16.mxu0 %v3020_v18 }
 0x191   : > { %2710 = vmatmul.mubr.msk.bf16.vlgmr.msra.gmra.mrb[28].mxu0 %vm633_vm3, %v2913_v8 }
 0x192   : > { %2722 = vmatpush3.bf16.msra.mxu0 %v3226_v0  ;;  %2729 = vmatprep.mubr.msk.bf16.mxu0 %vm3021_vm1, %v3020_v18 }
 0x193   : > { %2723 = vmatprep.subr.bf16.mxu0 %v3020_v18 }
 0x196   : > { %2724 = vmatpush3.bf16.msra.mxu0 %v3228_v1 }
 0x197   : > { %2725 = vmatprep.subr.bf16.mxu0 %v3020_v18 }
 0x19a   : > { %2726 = vmatpush3.bf16.msra.mxu0 %v3230_v2 }
 0x19b   : > { %2727 = vmatprep.subr.bf16.mxu0 %v3020_v18 }
 0x19e   : > { %2728 = vmatpush3.bf16.msra.mxu0 %v3224_v50 }
 0x19f   : > { %2753 = vmatprep.subr.bf16.mxu0 %v3020_v18 }
 0x1a1   : > { %2730 = vmatmul.mubr.msk.bf16.vlgmr.msra.gmra.mrb[32].mxu0 %vm633_vm3, %v2928_v51 }
 0x1a2   : > { %2761 = vmatprep.mubr.msk.bf16.mxu0 %vm3021_vm1, %v3020_v18 }
 0x234   : > { %v671_v11 = vpop.f32.mrb[0].mxu1  ;;  %v1014_v29 = vpop.f32.mrb[16].mxu0 }
 0x235   : > { %v2571_v12 = vpop.f32.mrb[1].mxu1  ;;  %v2631_v32 = vpop.f32.mrb[17].mxu0 }
 0x236   : > { %v674_v13 = vpop.f32.mrb[2].mxu1  ;;  %v1017_v34 = vpop.f32.mrb[18].mxu0  ;;  %v2932_v12 = vld [vmem:[%s3620_s4 + $0x78] sm:$0xff]  }
 0x237   : > { %v678_v14 = vpack.c.bf16 %v674_v13, %v671_v11  ;;  %v2572_v15 = vpop.f32.mrb[3].mxu1  ;;  %v1021_v35 = vpack.c.bf16 %v1017_v34, %v1014_v29  ;;  %v2632_v37 = vpop.f32.mrb[19].mxu0  ;;  %v2933_v13 = vld [vmem:[%s3620_s4 + $0x80] sm:$0xff]  }
 0x238   : > { %v2937_v15 = vld [vmem:[%s3623_s7 + $0x20] sm:$0xff]  }
 0x239   : > { %2754 = vmatpush3.bf16.msra.mxu0 %v2937_v15 }
 0x23a   : > { %2755 = vmatprep.subr.bf16.mxu0 %v3020_v18 }
 0x244   : > { %v728_v16 = vpop.f32.mrb[4].mxu1  ;;  %v1130_v38 = vpop.f32.mrb[20].mxu0 }
 0x245   : > { %v2583_v17 = vpop.f32.mrb[5].mxu1  ;;  %v2651_v40 = vpop.f32.mrb[21].mxu0 }
 0x246   : > { %v731_v20 = vpop.f32.mrb[6].mxu1  ;;  %v1133_v41 = vpop.f32.mrb[22].mxu0 }
 0x247   : > { %v735_v23 = vpack.c.bf16 %v731_v20, %v728_v16  ;;  %v2584_v24 = vpop.f32.mrb[7].mxu1  ;;  %v1137_v42 = vpack.c.bf16 %v1133_v41, %v1130_v38  ;;  %v2652_v43 = vpop.f32.mrb[23].mxu0  ;;  %v2939_v16 = vld [vmem:[%s3623_s7 + $0x28] sm:$0xff]  }
 0x248   : > { %2756 = vmatpush3.bf16.msra.mxu0 %v2939_v16  ;;  %v2425_v16 = vld [vmem:[%s3622_s6 + $0x4] sm:$0x3] }
 0x249   : > { %2590 = vmatmul.mubr.msk.bf16.vlgmr.msra.gmra.mrb[8].mxu1 %vm527_vm2, %v735_v23  ;;  %2757 = vmatprep.subr.bf16.mxu0 %v3020_v18 }
 0x24a   : > { %2594 = vmatpush3.bf16.msra.mxu1 %v2916_v21  ;;  %2597 = vmatprep.mubr.msk.bf16.mxu1 %vm3021_vm1, %v3020_v18 }
 0x24b   : > { %2595 = vmatprep.subr.bf16.mxu1 %v3020_v18 }
 0x24e   : > { %2596 = vmatpush3.bf16.msra.mxu1 %v2917_v25 }
 0x24f   : > { %2601 = vmatprep.subr.bf16.mxu1 %v3020_v18 }
 0x254   : > { %v1246_v44 = vpop.f32.mrb[24].mxu0 }
 0x255   : > { %2598 = vmatmul.mubr.msk.bf16.vlgmr.msra.gmra.mrb[8].mxu1 %vm527_vm2, %v678_v14  ;;  %v2671_v46 = vpop.f32.mrb[25].mxu0  ;;  %v2934_v14 = vld [vmem:[%s3620_s4 + $0x88] sm:$0xff]  }
 0x256   : > { %2602 = vmatpush3.bf16.msra.mxu1 %v3226_v0  ;;  %2609 = vmatprep.mubr.msk.bf16.mxu1 %vm3021_vm1, %v3020_v18  ;;  %v1249_v47 = vpop.f32.mrb[26].mxu0 }
 0x257   : > { %2603 = vmatprep.subr.bf16.mxu1 %v3020_v18  ;;  %v1253_v48 = vpack.c.bf16 %v1249_v47, %v1246_v44  ;;  %v2672_v49 = vpop.f32.mrb[27].mxu0 }
 0x25a   : > { %2604 = vmatpush3.bf16.msra.mxu1 %v3228_v1 }
 0x25b   : > { %2605 = vmatprep.subr.bf16.mxu1 %v3020_v18 }
 0x25e   : > { %2606 = vmatpush3.bf16.msra.mxu1 %v3230_v2 }
 0x25f   : > { %2607 = vmatprep.subr.bf16.mxu1 %v3020_v18 }
 0x262   : > { %2608 = vmatpush3.bf16.msra.mxu1 %v3224_v50 }
 0x263   : > { %2613 = vmatprep.subr.bf16.mxu1 %v3020_v18 }
 0x264   : > { %v1478_v36 = vpop.f32.mrb[28].mxu0 }
 0x265   : > { %2610 = vmatmul.mubr.msk.bf16.vlgmr.msra.gmra.mrb[12].mxu1 %vm633_vm3, %v2918_v26  ;;  %v2711_v45 = vpop.f32.mrb[29].mxu0 }
 0x266   : > { %2614 = vmatpush3.bf16.msra.mxu1 %v2919_v27  ;;  %2617 = vmatprep.mubr.msk.bf16.mxu1 %vm3021_vm1, %v3020_v18  ;;  %v1481_v63 = vpop.f32.mrb[30].mxu0 }
 0x267   : > { %2615 = vmatprep.subr.bf16.mxu1 %v3020_v18 }
 0x26a   : > { %2616 = vmatpush3.bf16.msra.mxu1 %v2920_v28 }
 0x26b   : > { %2633 = vmatprep.subr.bf16.mxu1 %v3020_v18 }
 0x338   : > { %v898_v52 = vpop.f32.mrb[12].mxu1 }
 0x339   : > { %v2611_v53 = vpop.f32.mrb[13].mxu1 }
 0x33a   : > { %v901_v54 = vpop.f32.mrb[14].mxu1 }
 0x33b   : > { %v905_v56 = vpack.c.bf16 %v901_v54, %v898_v52  ;;  %v2612_v57 = vpop.f32.mrb[15].mxu1 }
 0x33d   : > { %2618 = vmatmul.mubr.msk.bf16.vlgmr.msra.gmra.mrb[8].mxu1 %vm527_vm2, %v905_v56  ;;  %v1665_v56 = vld [vmem:[%s3621_s5] sm:$0x3] }
 0x33e   : > { %2634 = vmatpush3.bf16.msra.mxu1 %v2921_v55  ;;  %2637 = vmatprep.mubr.msk.bf16.mxu1 %vm3021_vm1, %v3020_v18 }
 0x33f   : > { %2635 = vmatprep.subr.bf16.mxu1 %v3020_v18 }
 0x342   : > { %2636 = vmatpush3.bf16.msra.mxu1 %v2922_v58 }
 0x343   : > { %2653 = vmatprep.subr.bf16.mxu1 %v3020_v18 }
 0x349   : > { %2638 = vmatmul.mubr.msk.bf16.vlgmr.msra.gmra.mrb[8].mxu1 %vm527_vm2, %v1021_v35 }
 0x34a   : > { %2654 = vmatpush3.bf16.msra.mxu1 %v2923_v59  ;;  %2657 = vmatprep.mubr.msk.bf16.mxu1 %vm3021_vm1, %v3020_v18 }
 0x34b   : > { %2655 = vmatprep.subr.bf16.mxu1 %v3020_v18 }
 0x34e   : > { %2656 = vmatpush3.bf16.msra.mxu1 %v2924_v19 }
 0x34f   : > { %2673 = vmatprep.subr.bf16.mxu1 %v3020_v18 }
 0x355   : > { %2658 = vmatmul.mubr.msk.bf16.vlgmr.msra.gmra.mrb[8].mxu1 %vm527_vm2, %v1137_v42 }
 0x356   : > { %2674 = vmatpush3.bf16.msra.mxu1 %v2925_v60  ;;  %2677 = vmatprep.mubr.msk.bf16.mxu1 %vm3021_vm1, %v3020_v18 }
 0x357   : > { %2675 = vmatprep.subr.bf16.mxu1 %v3020_v18 }
 0x35a   : > { %2676 = vmatpush3.bf16.msra.mxu1 %v2926_v22 }
 0x35b   : > { %2681 = vmatprep.subr.bf16.mxu1 %v3020_v18 }
 0x361   : > { %2678 = vmatmul.mubr.msk.bf16.vlgmr.msra.gmra.mrb[8].mxu1 %vm527_vm2, %v1253_v48 }
 0x362   : > { %2682 = vmatpush3.bf16.msra.mxu1 %v3226_v0  ;;  %2689 = vmatprep.mubr.msk.bf16.mxu1 %vm3021_vm1, %v3020_v18  ;;  %v2712_v0 = vpop.f32.mrb[31].mxu0 }
 0x363   : > { %2683 = vmatprep.subr.bf16.mxu1 %v3020_v18 }
 0x366   : > { %2684 = vmatpush3.bf16.msra.mxu1 %v3228_v1  ;;  %v1594_v1 = vpop.f32.mrb[32].mxu0 }
 0x367   : > { %2685 = vmatprep.subr.bf16.mxu1 %v3020_v18 }
 0x36a   : > { %2686 = vmatpush3.bf16.msra.mxu1 %v3230_v2  ;;  %v2731_v2 = vpop.f32.mrb[33].mxu0 }
 0x36b   : > { %2687 = vmatprep.subr.bf16.mxu1 %v3020_v18  ;;  %v1597_v3 = vpop.f32.mrb[34].mxu0  ;;  %v2938_v2 = vld [vmem:[%s3623_s7 + $0x10] sm:$0xff]  }
 0x36c   : > { %v1601_v4 = vpack.c.bf16 %v1597_v3, %v1594_v1  ;;  %v2732_v5 = vpop.f32.mrb[35].mxu0  ;;  %v1713_v1 = vld [vmem:[%s3622_s6] sm:$0x3]  ;;  %v2940_v3 = vld [vmem:[%s3623_s7 + $0x18] sm:$0xff]  }
 0x36d   : > { %v2942_v5 = vld [vmem:[%s3623_s7 + $0x38] sm:$0xff]  }
 0x36e   : > { %2688 = vmatpush3.bf16.msra.mxu1 %v3224_v50  ;;  %v1485_v50 = vpack.c.bf16 %v1481_v63, %v1478_v36 }
 0x36f   : > { %2693 = vmatprep.subr.bf16.mxu1 %v3020_v18 }
 0x371   : > { %2690 = vmatmul.mubr.msk.bf16.vlgmr.msra.gmra.mrb[16].mxu1 %vm633_vm3, %v2927_v61 }
 0x372   : > { %2694 = vmatpush3.bf16.msra.mxu1 %v2929_v31  ;;  %2697 = vmatprep.mubr.msk.bf16.mxu1 %vm3021_vm1, %v3020_v18 }
 0x373   : > { %2695 = vmatprep.subr.bf16.mxu1 %v3020_v18 }
 0x376   : > { %2696 = vmatpush3.bf16.msra.mxu1 %v2930_v62 }
 0x377   : > { %2713 = vmatprep.subr.bf16.mxu1 %v3020_v18 }
 0x444   : > { %v1362_v6 = vpop.f32.mrb[16].mxu1 }
 0x445   : > { %v2691_v7 = vpop.f32.mrb[17].mxu1 }
 0x446   : > { %v1365_v8 = vpop.f32.mrb[18].mxu1 }
 0x447   : > { %v1369_v10 = vpack.c.bf16 %v1365_v8, %v1362_v6  ;;  %v2692_v11 = vpop.f32.mrb[19].mxu1 }
 0x449   : > { %2698 = vmatmul.mubr.msk.bf16.vlgmr.msra.gmra.mrb[8].mxu1 %vm527_vm2, %v1369_v10 }
 0x44a   : > { %2714 = vmatpush3.bf16.msra.mxu1 %v2931_v9  ;;  %2717 = vmatprep.mubr.msk.bf16.mxu1 %vm3021_vm1, %v3020_v18 }
 0x44b   : > { %2715 = vmatprep.subr.bf16.mxu1 %v3020_v18 }
 0x44e   : > { %2716 = vmatpush3.bf16.msra.mxu1 %v2932_v12 }
 0x44f   : > { %2733 = vmatprep.subr.bf16.mxu1 %v3020_v18 }
 0x455   : > { %2718 = vmatmul.mubr.msk.bf16.vlgmr.msra.gmra.mrb[8].mxu1 %vm527_vm2, %v1485_v50 }
 0x456   : > { %2734 = vmatpush3.bf16.msra.mxu1 %v2933_v13  ;;  %2737 = vmatprep.mubr.msk.bf16.mxu1 %vm3021_vm1, %v3020_v18 }
 0x457   : > { %2735 = vmatprep.subr.bf16.mxu1 %v3020_v18 }
 0x45a   : > { %2736 = vmatpush3.bf16.msra.mxu1 %v2934_v14 }
 0x45b   : > { %2741 = vmatprep.subr.bf16.mxu1 %v3020_v18 }
 0x461   : > { %2738 = vmatmul.mubr.msk.bf16.vlgmr.msra.gmra.mrb[8].mxu1 %vm527_vm2, %v1601_v4  ;;  %v2941_v4 = vld [vmem:[%s3623_s7 + $0x30] sm:$0xff]  }
 0x462   : > { %2743 = vmatprep.mubr.msk.bf16.mxu1 %vm3021_vm1, %v3020_v18  ;;  %2758 = vmatpush3.bf16.msra.mxu0 %v2941_v4 }
 0x463   : > { %2759 = vmatprep.subr.bf16.mxu0 %v3020_v18 }
 0x466   : > { %2760 = vmatpush3.bf16.msra.mxu0 %v2942_v5 }
 0x467   : > { %2777 = vmatprep.subr.bf16.mxu0 %v3020_v18 }
 0x534   : > { %v1656_v17 = vpop.f32.mrb[8].mxu1 }
 0x535   : > { %v1675_v20 = vmul.f32 %v1656_v17, %v1656_v17  ;;  %v2739_v21 = vpop.f32.mrb[9].mxu1  ;;  %v1666_v24 = vsel %vm633_vm3, %v1656_v17, 0.0 }
 0x536   : > { %v1659_v23 = vpop.f32.mrb[10].mxu1  ;;  %v2944_v21 = vld [vmem:[%s3623_s7 + $0x48] sm:$0xff]  }
 0x537   : > { %v1667_v25 = vsel %vm633_vm3, %v1659_v23, 0.0  ;;  %v1676_v26 = vmul.f32 %v1659_v23, %v1659_v23  ;;  %v2740_v27 = vpop.f32.mrb[11].mxu1  ;;  %v1677_v29 = vsel %vm633_vm3, %v1675_v20, 0.0  ;;  %v2943_v20 = vld [vmem:[%s3623_s7 + $0x40] sm:$0xff]  }
 0x538   : > { %v1668_v28 = vadd.f32 %v1667_v25, %v1666_v24  ;;  %v2946_v24 = vld [vmem:[%s3623_s7 + $0x60] sm:$0xff]   ;;  %v2947_v25 = vld [vmem:[%s3623_s7 + $0x58] sm:$0xff]   ;;  %v2949_v27 = vld [vmem:[%s3623_s7 + $0x70] sm:$0xff]  }
 0x539   : > { %v1678_v32 = vsel %vm633_vm3, %v1676_v26, 0.0  ;;  %v2948_v26 = vld [vmem:[%s3623_s7 + $0x68] sm:$0xff]  }
 0x53a   : > { %v1669_v34 = vrot.slane %v1668_v28, 4  ;;  %v1679_v35 = vadd.f32 %v1678_v32, %v1677_v29 }
 0x53c   : > { %v1670_v37 = vadd.f32 %v1669_v34, %v1668_v28  ;;  %v1680_v38 = vrot.slane %v1679_v35, 4  ;;  %v2950_v28 = vld [vmem:[%s3623_s7 + $0x78] sm:$0xff]  }
 0x53e   : > { %v1671_v40 = vrot.slane %v1670_v37, 2  ;;  %v1681_v41 = vadd.f32 %v1680_v38, %v1679_v35 }
 0x540   : > { %v1672_v42 = vadd.f32 %v1671_v40, %v1670_v37  ;;  %v1682_v43 = vrot.slane %v1681_v41, 2 }
 0x542   : > { %v1673_v44 = vrot.slane %v1672_v42, 1  ;;  %v1683_v46 = vadd.f32 %v1682_v43, %v1681_v41 }
 0x544   : > { %v1674_v47 = vadd.f32 %v1673_v44, %v1672_v42  ;;  %v1684_v48 = vrot.slane %v1683_v46, 1 }
 0x546   : > { %v1685_v49 = vadd.f32 %v1684_v48, %v1683_v46  ;;  %v1686_v51 = vmul.f32 0.0625, %v1674_v47 }
 0x548   : > { %v1687_v52 = vmul.f32 0.0625, %v1685_v49  ;;  %v1688_v53 = vmul.f32 %v1686_v51, %v1686_v51 }
 0x54a   : > { %v1689_v54 = vsub.f32 %v1687_v52, %v1688_v53 }
 0x54c   : > { %v1690_v55 = vadd.f32 1e-05, %v1689_v54 }
 0x54e   : > { %2953 = vrsqrt.f32 %v1690_v55 }
 0x558   : > { %v2954_v57 = vpop.eup %2953 }
 0x559   : > { %v1692_v58 = vmul.f32 %v2954_v57, %v1665_v56 }
 0x55b   : > { %v1693_v59 = vmul.f32 %v1692_v58, %v1686_v51  ;;  %v1701_v19 = vrot.slane %v1692_v58, %v592_v33  ;;  %v2935_v33 = vld [vmem:[%s3623_s7] sm:$0xff]  }
 0x55d   : > { %v1695_v60 = vrot.slane %v1693_v59, 7  ;;  %v1702_v22 = vmul.f32 %v1701_v19, %v1656_v17  ;;  %v1703_v61 = vmul.f32 %v1701_v19, %v1659_v23  ;;  %v2440_v17 = vld [vmem:[%s3622_s6 + $0x6] sm:$0x3]  ;;  %v2945_v23 = vld [vmem:[%s3623_s7 + $0x50] sm:$0xff]   ;;  %v2455_v19 = vld [vmem:[%s3624_s8] ss:$0 sm:$0xff] }
 0x55f   : > { %v1697_v31 = vsub.f32 %v1665_v56, %v1695_v60 }
 0x561   : > { %v1707_v62 = vrot.slane %v1697_v31, %v604_v39  ;;  %v2936_v39 = vld [vmem:[%s3623_s7 + $0x8] sm:$0xff]  }
 0x563   : > { %v1708_v36 = vadd.f32 %v1707_v62, %v1702_v22  ;;  %v1709_v45 = vadd.f32 %v1707_v62, %v1703_v61 }
 0x565   : > { %v1711_v63 = vmax.f32 %v1709_v45, 0.0  ;;  %v1710_v50 = vmax.f32 %v1708_v36, 0.0 }
 0x567   : > { %v1712_v0 = vpack.c.bf16 %v1711_v63, %v1710_v50 }
 0x569   : > { %2742 = vmatpush3.bf16.msra.mxu1 %v1712_v0 }
 0x56a   : > { %2747 = vmatprep.subr.bf16.mxu1 %v3020_v18 }
 0x56c   : > { %2744 = vmatmul.mubr.msk.bf16.vlgmr.msra.gmra.mrb[20].mxu1 %vm448_vm0, %v1713_v1 }
 0x56d   : > { %2748 = vmatpush3.bf16.msra.mxu1 %v1712_v0  ;;  %2749 = vmatprep.mubr.msk.bf16.mxu1 %vm3021_vm1, %v3020_v18 }
 0x56e   : > { %2765 = vmatprep.subr.bf16.mxu1 %v3020_v18 }
 0x574   : > { %2750 = vmatmul.mubr.msk.bf16.vlgmr.msra.gmra.mrb[24].mxu1 %vm448_vm0, %v2405_v30 }
 0x575   : > { %2766 = vmatpush3.bf16.msra.mxu1 %v2935_v33  ;;  %2773 = vmatprep.mubr.msk.bf16.mxu1 %vm3021_vm1, %v3020_v18 }
 0x576   : > { %2767 = vmatprep.subr.bf16.mxu1 %v3020_v18 }
 0x579   : > { %2768 = vmatpush3.bf16.msra.mxu1 %v2936_v39 }
 0x57a   : > { %2769 = vmatprep.subr.bf16.mxu1 %v3020_v18 }
 0x57d   : > { %2770 = vmatpush3.bf16.msra.mxu1 %v2938_v2 }
 0x57e   : > { %2771 = vmatprep.subr.bf16.mxu1 %v3020_v18 }
 0x581   : > { %2772 = vmatpush3.bf16.msra.mxu1 %v2940_v3 }
 0x582   : > { %2783 = vmatprep.subr.bf16.mxu1 %v3020_v18 }
 0x63f   : > { %v1751_v6 = vpop.f32.mrb[20].mxu1 }
 0x640   : > { %v1757_v7 = vpack.c.bf16 %v1751_v6, %v1751_v6  ;;  %v2745_v8 = vpop.f32.mrb[21].mxu1 }
 0x641   : > { %v1754_v9 = vpop.f32.mrb[22].mxu1 }
 0x642   : > { %v2746_v10 = vpop.f32.mrb[23].mxu1  ;;  %2774 = vmatmul.mubr.msk.bf16.vlgmr.msra.gmra.mrb[28].mxu1 %vm633_vm3, %v1757_v7 }
 0x643   : > { %2791 = vmatprep.mubr.msk.bf16.mxu1 %vm3021_vm1, %v3020_v18  ;;  %2784 = vmatpush3.bf16.msra.mxu1 %v2943_v20 }
 0x644   : > { %2785 = vmatprep.subr.bf16.mxu1 %v3020_v18 }
 0x647   : > { %v1805_v11 = vpop.f32.mrb[24].mxu1  ;;  %2786 = vmatpush3.bf16.msra.mxu1 %v2944_v21 }
 0x648   : > { %v1811_v12 = vpack.c.bf16 %v1805_v11, %v1805_v11  ;;  %v2751_v13 = vpop.f32.mrb[25].mxu1  ;;  %2787 = vmatprep.subr.bf16.mxu1 %v3020_v18 }
 0x649   : > { %v1808_v14 = vpop.f32.mrb[26].mxu1 }
 0x64a   : > { %2762 = vmatmul.mubr.msk.bf16.vlgmr.msra.gmra.mrb[36].mxu0 %vm633_vm3, %v1811_v12  ;;  %v2752_v15 = vpop.f32.mrb[27].mxu1 }
 0x64b   : > { %2778 = vmatpush3.bf16.msra.mxu0 %v1712_v0  ;;  %2779 = vmatprep.mubr.msk.bf16.mxu0 %vm3021_vm1, %v3020_v18 }
 0x64c   : > { %2795 = vmatprep.subr.bf16.mxu0 %v3020_v18  ;;  %2788 = vmatpush3.bf16.msra.mxu1 %v2945_v23 }
 0x64d   : > { %2789 = vmatprep.subr.bf16.mxu1 %v3020_v18 }
 0x650   : > { %2790 = vmatpush3.bf16.msra.mxu1 %v2947_v25 }
 0x652   : > { %2780 = vmatmul.mubr.msk.bf16.vlgmr.msra.gmra.mrb[40].mxu0 %vm448_vm0, %v2425_v16 }
 0x653   : > { %2796 = vmatpush3.bf16.msra.mxu0 %v1712_v0  ;;  %2797 = vmatprep.mubr.msk.bf16.mxu0 %vm3021_vm1, %v3020_v18 }
 0x654   : > { %2801 = vmatprep.subr.bf16.mxu0 %v3020_v18 }
 0x65a   : > { %2798 = vmatmul.mubr.msk.bf16.vlgmr.msra.gmra.mrb[44].mxu0 %vm448_vm0, %v2440_v17 }
 0x65b   : > { %2809 = vmatprep.mubr.msk.bf16.mxu0 %vm3021_vm1, %v3020_v18  ;;  %2802 = vmatpush3.bf16.msra.mxu0 %v2946_v24 }
 0x65c   : > { %2803 = vmatprep.subr.bf16.mxu0 %v3020_v18 }
 0x65f   : > { %2804 = vmatpush3.bf16.msra.mxu0 %v2948_v26 }
 0x660   : > { %2805 = vmatprep.subr.bf16.mxu0 %v3020_v18 }
 0x663   : > { %2806 = vmatpush3.bf16.msra.mxu0 %v2949_v27 }
 0x664   : > { %2807 = vmatprep.subr.bf16.mxu0 %v3020_v18 }
 0x667   : > { %2808 = vmatpush3.bf16.msra.mxu0 %v2950_v28 }
 0x715   : > { %v1949_v29 = vpop.f32.mrb[28].mxu1 }
 0x716   : > { %v2775_v32 = vpop.f32.mrb[29].mxu1 }
 0x717   : > { %v1952_v34 = vpop.f32.mrb[30].mxu1 }
 0x718   : > { %v2776_v35 = vpop.f32.mrb[31].mxu1 }
 0x71d   : > { %v1882_v37 = vpop.f32.mrb[36].mxu0 }
 0x71e   : > { %v1950_v38 = vadd.f32 %v1949_v29, %v1882_v37  ;;  %v2763_v40 = vpop.f32.mrb[37].mxu0 }
 0x71f   : > { %v1885_v41 = vpop.f32.mrb[38].mxu0 }
 0x720   : > { %v2764_v42 = vpop.f32.mrb[39].mxu0 }
 0x725   : > { %v1994_v43 = vpop.f32.mrb[40].mxu0 }
 0x726   : > { %v2000_v44 = vpack.c.bf16 %v1994_v43, %v1994_v43  ;;  %v2781_v46 = vpop.f32.mrb[41].mxu0 }
 0x727   : > { %v1997_v47 = vpop.f32.mrb[42].mxu0 }
 0x728   : > { %2792 = vmatmul.mubr.msk.bf16.vlgmr.msra.gmra.mrb[32].mxu1 %vm633_vm3, %v2000_v44  ;;  %v2782_v18 = vpop.f32.mrb[43].mxu0 }
 0x72d   : > { %v2117_v48 = vpop.f32.mrb[44].mxu0 }
 0x72e   : > { %v2123_v49 = vpack.c.bf16 %v2117_v48, %v2117_v48  ;;  %v2799_v51 = vpop.f32.mrb[45].mxu0 }
 0x72f   : > { %v2120_v52 = vpop.f32.mrb[46].mxu0 }
 0x730   : > { %2810 = vmatmul.mubr.msk.bf16.vlgmr.msra.gmra.mrb[48].mxu0 %vm633_vm3, %v2123_v49  ;;  %v2800_v53 = vpop.f32.mrb[47].mxu0 }
 0x7fb   : > { %v2071_v54 = vpop.f32.mrb[32].mxu1 }
 0x7fc   : > { %v2077_v55 = vadd.f32 %v2071_v54, %v1950_v38  ;;  %v2793_v56 = vpop.f32.mrb[33].mxu1 }
 0x7fd   : > { %v2074_v57 = vpop.f32.mrb[34].mxu1 }
 0x7fe   : > { %v2794_v58 = vpop.f32.mrb[35].mxu1 }
 0x803   : > { %v2194_v59 = vpop.f32.mrb[48].mxu0 }
 0x804   : > { %v2200_v60 = vadd.f32 %v2194_v59, %v2077_v55  ;;  %v2811_v22 = vpop.f32.mrb[49].mxu0 }
 0x805   : > { %v2197_v61 = vpop.f32.mrb[50].mxu0 }
 0x806   : > { %v2208_v31 = vadd.f32 %v2455_v19, %v2200_v60  ;;  %v2812_v62 = vpop.f32.mrb[51].mxu0 }
 0x808   : > { %2209 = vst [vmem:[%s325_s27] sm:$0xf] %v2208_v31 }
 0x809   : > { %2968 = shalt.err (!%p2965_p3)
}
 0x80a   : > { %s2969_s22 = scalar_lea.hbm %s3574_s17, 64  ;;  %s2973_s27 = scalar_lea.hbm %s3625_s9, 128 }
 0x80b   : > { %p2970_p4 = scmp.ne.s32.totalorder %s3574_s17, %s2969_s22  ;;  %p2974_p9 = scmp.lt.u32.totalorder %s3574_s17, %s3625_s9 }
 0x80c   : > { %p2975_p10 = scmp.lt.u32.totalorder %s2973_s27, %s2969_s22  ;;  %p2977_p12 = scmp.lt.u32.totalorder %s2969_s22, %s3574_s17 }
 0x80d   : > { %p2971_p7 = pnand %p2970_p4, %p3111_p5 }
 0x80e   : > { %p2976_p11 = por %p2975_p10, %p2974_p9 }
 0x80f   : > { %p2972_p8 = pneg %p2971_p7 }
 0x810   : > { %p2978_p13 = por %p2977_p12, %p2976_p11 }
 0x812   : > { %p2979_p0 = pnand %p2978_p13, %p2972_p8 }
 0x814   : > { %2982 = shalt.err (!%p2979_p0)
}
 0x815   : > { %2845 = dma.vmem_to_hbm [thread:$0]  (%p3111_p5), %s3576_s28, 64, %s3574_s17, %s2211_s16  }
 0x816 PF: > { %p2851_p1 = scmp.ge.s32.totalorder %s3017_s12, 2  ;;  %s2236_s13 = sand.u32 1, %s3005_s30  }
 0x817   : > { %s2237_s21 = scalar_lea.sflag [#allocation3], %s2236_s13 }
 0x818   : > { %p2848_p2 = pnand %p2851_p1, %p3115_p6 }
 0x81a   : > { %3000 = dma.done.wait (!%p2848_p2), %s2237_s21, 64  }
 0x81b   : > { %3002 = vsyncadd (!%p2848_p2), %s2237_s21, 4294967232  ;;  %p19_p3 = scmp.ge.s32.totalorder %s3098_s15, 4   ;;  %s3628_s30 = smov %s3009_s10 }
 0x81c   : > { %s3629_s10 = smov %s3013_s11  ;;  %s3630_s11 = smov %s3109_s18 }
 0x81d   : > { %s3631_s12 = smov %s3098_s15  ;;  %21 = sbr.rel (!%p19_p3) target bundleno = 3 (0x3), region = 113 }
 0x824   :  { %2242 = vsyncpa [#allocation3], 1 }
 0x825   :  { %2244 = vsyncpa [#allocation3 + $0x1], 1 }

</bundles_post_ra>
